<compile_context>
chip_gen: v7x
topology: tpu7x:2x2x1
jax: 0.10.0
libtpu: 0.0.40
codegen_flags: <defaults>
</compile_context>

<pallas_src>
import functools

import jax
import jax.numpy as jnp
from jax.experimental import pallas as pl
from jax.experimental.pallas import tpu as pltpu


def _round_up(x, m):
    return (x + m - 1) // m * m


def _conv_bn_relu_kernel(x_ref, w_ref, b_ref, o_ref, *,
                         tap_offsets, tile_rows, stride, apply_relu):
    """One (batch, output-row-block) tile of fused conv + folded-BN bias + ReLU.

    x_ref : (rows_in, Cin_p)        f32  flattened padded image of batch n
    w_ref : (KH*KW, Cin_p, Cout_p)  bf16 BN-folded weights, one matrix per tap
    b_ref : (1, Cout_p)             f32  BN-folded bias
    o_ref : (tile_rows, Cout_p)     f32  "extended-width" output rows
    """
    r = pl.program_id(1)
    base = r * (tile_rows * stride)      # flat input row of this block's origin
    cout_p = o_ref.shape[-1]

    acc = jnp.zeros((tile_rows, cout_p), jnp.float32)
    for t, off in enumerate(tap_offsets):      # static unroll over KH*KW taps
        if stride == 1:
            a = x_ref[pl.ds(base + off, tile_rows), :]
        else:
            a = x_ref[pl.ds(base + off, tile_rows, stride), :]
        acc = acc + jnp.dot(a.astype(jnp.bfloat16), w_ref[t],
                            preferred_element_type=jnp.float32)

    acc = acc + b_ref[...]                     # conv bias + folded BN affine
    if apply_relu:
        acc = jnp.maximum(acc, 0.0)
    o_ref[...] = acc.astype(o_ref.dtype)


def conv2d_block_forward(x_nchw, weight_oihw, bias, bn_gamma=None, bn_beta=None,
                         bn_mean=None, bn_var=None, *, stride=1, padding=0,
                         eps=1e-5, use_batch_norm=True, activation_relu=True,
                         rows_per_tile=1024):
    """Forward pass of Conv2d_Block (eval-mode BN). NCHW in, NCHW out."""
    N, Cin, H, W = x_nchw.shape
    Cout, Cin_w, KH, KW = weight_oihw.shape
    assert Cin == Cin_w, "channel mismatch"

    Hp, Wp = H + 2 * padding, W + 2 * padding
    Ho = (Hp - KH) // stride + 1
    Wo = (Wp - KW) // stride + 1
    f32 = jnp.float32

    # ---- fold eval-mode BatchNorm into the conv weights / bias ----
    w = weight_oihw.astype(f32)
    b = jnp.zeros((Cout,), f32) if bias is None else bias.astype(f32)
    if use_batch_norm:
        scale = bn_gamma.astype(f32) / jnp.sqrt(bn_var.astype(f32) + eps)
        shift = bn_beta.astype(f32) - bn_mean.astype(f32) * scale
        w = w * scale[:, None, None, None]
        b = b * scale + shift

    # ---- pack weights: (KH*KW, Cin_p, Cout_p) bf16, lane-dense Cout ----
    Cin_p = _round_up(Cin, 8)
    Cout_p = _round_up(Cout, 128)
    w_taps = jnp.transpose(w, (2, 3, 1, 0)).reshape(KH * KW, Cin, Cout)
    w_taps = jnp.pad(w_taps, ((0, 0), (0, Cin_p - Cin), (0, Cout_p - Cout)))
    w_taps = w_taps.astype(jnp.bfloat16)
    b_row = jnp.pad(b, (0, Cout_p - Cout)).reshape(1, Cout_p)

    # ---- tile output height: th output rows -> th*Wp "extended" matmul rows ----
    th = min(_round_up(Ho, 8), max(8, (rows_per_tile // Wp) // 8 * 8))
    Ho_pad = _round_up(Ho, th)
    n_row_blocks = Ho_pad // th
    tile_rows = th * Wp

    # ---- flatten the padded image over (H, W): every tap (kh, kw) becomes a
    #      contiguous row window at offset kh*Wp + kw of this slab ----
    x = jnp.transpose(x_nchw, (0, 2, 3, 1)).astype(f32)            # NHWC
    x = jnp.pad(x, ((0, 0), (padding, padding), (padding, padding),
                    (0, Cin_p - Cin)))
    x_flat = x.reshape(N, Hp * Wp, Cin_p)
    rows_needed = stride * (Ho_pad * Wp - 1) + (KH - 1) * Wp + KW
    rows_in = _round_up(max(Hp * Wp, rows_needed), 8)
    x_flat = jnp.pad(x_flat, ((0, 0), (0, rows_in - Hp * Wp), (0, 0)))

    tap_offsets = tuple(kh * Wp + kw for kh in range(KH) for kw in range(KW))

    kernel = functools.partial(
        _conv_bn_relu_kernel, tap_offsets=tap_offsets, tile_rows=tile_rows,
        stride=stride, apply_relu=activation_relu)

    cost = pl.CostEstimate(
        flops=2 * N * Ho * Wo * KH * KW * Cin * Cout,
        transcendentals=0,
        bytes_accessed=int(N * rows_in * Cin_p * 4
                           + KH * KW * Cin_p * Cout_p * 2
                           + Cout_p * 4
                           + N * Ho_pad * Wp * Cout_p * 4))

    out_ext = pl.pallas_call(
        kernel,
        out_shape=jax.ShapeDtypeStruct((N, Ho_pad * Wp, Cout_p), f32),
        grid=(N, n_row_blocks),
        in_specs=[
            # Whole flattened image of batch n; block index is constant over
            # the row-block axis, so it is DMA'd from HBM once per image.
            pl.BlockSpec((None, rows_in, Cin_p), lambda n, r: (n, 0, 0)),
            pl.BlockSpec((KH * KW, Cin_p, Cout_p), lambda n, r: (0, 0, 0)),
            pl.BlockSpec((1, Cout_p), lambda n, r: (0, 0)),
        ],
        out_specs=pl.BlockSpec((None, tile_rows, Cout_p),
                               lambda n, r: (n, r, 0)),
        compiler_params=pltpu.CompilerParams(
            dimension_semantics=("parallel", "parallel")),
        cost_estimate=cost,
    )(x_flat, w_taps, b_row)

    # Strip extended columns (w >= Wo), padded output rows and padded Cout lanes.
    out = out_ext.reshape(N, Ho_pad, Wp, Cout_p)[:, :Ho, :Wo, :Cout]
    return jnp.transpose(out, (0, 3, 1, 2)).astype(x_nchw.dtype)   # back to NCHW


if __name__ == "__main__":
    # Conv2d_Block(in_channels=4, out_channels=8, kernel_size=3, stride=1,
    #              padding=1, activation=ReLU, bias=True,
    #              normalization='batch_norm'), eval mode.
    N, Cin, H, W = 2, 4, 16, 16
    Cout, K = 8, 3
    stride, padding, eps = 1, 1, 1e-5

    key = jax.random.PRNGKey(0)
    k1, k2, k3, k4, k5, k6, k7 = jax.random.split(key, 7)
    x = jax.random.normal(k1, (N, Cin, H, W), jnp.float32)
    weight = 0.1 * jax.random.normal(k2, (Cout, Cin, K, K), jnp.float32)
    bias = 0.1 * jax.random.normal(k3, (Cout,), jnp.float32)
    gamma = 1.0 + 0.1 * jax.random.normal(k4, (Cout,), jnp.float32)
    beta = 0.1 * jax.random.normal(k5, (Cout,), jnp.float32)
    run_mean = 0.1 * jax.random.normal(k6, (Cout,), jnp.float32)
    run_var = jnp.abs(jax.random.normal(k7, (Cout,), jnp.float32)) + 0.5

    out = conv2d_block_forward(x, weight, bias, gamma, beta, run_mean, run_var,
                               stride=stride, padding=padding, eps=eps,
                               use_batch_norm=True, activation_relu=True)
    out = jax.block_until_ready(out)

    # Reference with the same eval-mode BN fold and the same bf16 rounding of
    # the MXU operands (the kernel accumulates bf16 x bf16 products in f32).
    scale = gamma / jnp.sqrt(run_var + eps)
    shift = beta - run_mean * scale
    w_fold = weight * scale[:, None, None, None]
    b_fold = bias * scale + shift
    x_r = x.astype(jnp.bfloat16).astype(jnp.float32)
    w_r = w_fold.astype(jnp.bfloat16).astype(jnp.float32)
    ref = jax.lax.conv_general_dilated(
        x_r, w_r, (stride, stride),
        ((padding, padding), (padding, padding)),
        dimension_numbers=("NCHW", "OIHW", "NCHW"),
        precision=jax.lax.Precision.HIGHEST)
    ref = ref + b_fold[None, :, None, None]
    ref = jnp.maximum(ref, 0.0)

    assert out.shape == ref.shape == (N, Cout, H, W)
    max_err = float(jnp.max(jnp.abs(out - ref)))
    assert jnp.allclose(out, ref, atol=2e-3, rtol=2e-3), max_err
    print("KERNEL_OK")
</pallas_src>

<mosaic_0001>
module attributes {stable_mosaic.version = 11 : i64} {
  func.func @_conv_bn_relu_kernel(%arg0: i32, %arg1: i32, %arg2: memref<1x328x8xf32, #tpu.memory_space<vmem>>, %arg3: memref<9x8x128xbf16, #tpu.memory_space<vmem>>, %arg4: memref<1x128xf32, #tpu.memory_space<vmem>>, %arg5: memref<1x288x128xf32, #tpu.memory_space<vmem>>) attributes {dimension_semantics = [#tpu.dimension_semantics<parallel>, #tpu.dimension_semantics<parallel>], iteration_bounds = array<i64: 2, 1>, scalar_prefetch = 0 : i64, scratch_operands = 0 : i64, tpu.core_type = #tpu.core_type<tc>, window_params = [{transform_indices = @transform_0, window_bounds = array<i64: 1, 328, 8>}, {pipeline_mode = #tpu.pipeline_mode<synchronous>, transform_indices = @transform_1, window_bounds = array<i64: 9, 8, 128>}, {pipeline_mode = #tpu.pipeline_mode<synchronous>, transform_indices = @transform_2, window_bounds = array<i64: 1, 128>}, {transform_indices = @transform_3, window_bounds = array<i64: 1, 288, 128>}]} {
    %c288_i32 = arith.constant 288 : i32
    %0 = arith.muli %arg1, %c288_i32 : i32
    %cst = arith.constant 0.000000e+00 : f32
    %1 = vector.broadcast %cst : f32 to vector<288x128xf32>
    %c0_i32 = arith.constant 0 : i32
    %2 = arith.addi %0, %c0_i32 : i32
    %c0 = arith.constant 0 : index
    %3 = arith.index_cast %2 : i32 to index
    %c0_0 = arith.constant 0 : index
    %4 = vector.load %arg2[%c0, %3, %c0_0] : memref<1x328x8xf32, #tpu.memory_space<vmem>>, vector<1x288x8xf32>
    %5 = vector.shape_cast %4 : vector<1x288x8xf32> to vector<288x8xf32>
    %6 = arith.truncf %5 : vector<288x8xf32> to vector<288x8xbf16>
    %c0_1 = arith.constant 0 : index
    %c0_2 = arith.constant 0 : index
    %c0_3 = arith.constant 0 : index
    %7 = vector.load %arg3[%c0_1, %c0_2, %c0_3] : memref<9x8x128xbf16, #tpu.memory_space<vmem>>, vector<1x8x128xbf16>
    %8 = vector.shape_cast %7 : vector<1x8x128xbf16> to vector<8x128xbf16>
    %cst_4 = arith.constant dense<0.000000e+00> : vector<288x128xf32>
    %9 = tpu.matmul %6, %8, %cst_4 {dimension_numbers = #tpu.dot_dimension_numbers<[1], [0], [0], [1], [0, 0, 1, 1], [], []>} : vector<288x8xbf16>, vector<8x128xbf16>, vector<288x128xf32> -> vector<288x128xf32>
    %10 = arith.addf %1, %9 : vector<288x128xf32>
    %c1_i32 = arith.constant 1 : i32
    %11 = arith.addi %0, %c1_i32 : i32
    %c0_5 = arith.constant 0 : index
    %12 = arith.index_cast %11 : i32 to index
    %c0_6 = arith.constant 0 : index
    %13 = vector.load %arg2[%c0_5, %12, %c0_6] : memref<1x328x8xf32, #tpu.memory_space<vmem>>, vector<1x288x8xf32>
    %14 = vector.shape_cast %13 : vector<1x288x8xf32> to vector<288x8xf32>
    %15 = arith.truncf %14 : vector<288x8xf32> to vector<288x8xbf16>
    %c1 = arith.constant 1 : index
    %c0_7 = arith.constant 0 : index
    %c0_8 = arith.constant 0 : index
    %16 = vector.load %arg3[%c1, %c0_7, %c0_8] : memref<9x8x128xbf16, #tpu.memory_space<vmem>>, vector<1x8x128xbf16>
    %17 = vector.shape_cast %16 : vector<1x8x128xbf16> to vector<8x128xbf16>
    %cst_9 = arith.constant dense<0.000000e+00> : vector<288x128xf32>
    %18 = tpu.matmul %15, %17, %cst_9 {dimension_numbers = #tpu.dot_dimension_numbers<[1], [0], [0], [1], [0, 0, 1, 1], [], []>} : vector<288x8xbf16>, vector<8x128xbf16>, vector<288x128xf32> -> vector<288x128xf32>
    %19 = arith.addf %10, %18 : vector<288x128xf32>
    %c2_i32 = arith.constant 2 : i32
    %20 = arith.addi %0, %c2_i32 : i32
    %c0_10 = arith.constant 0 : index
    %21 = arith.index_cast %20 : i32 to index
    %c0_11 = arith.constant 0 : index
    %22 = vector.load %arg2[%c0_10, %21, %c0_11] : memref<1x328x8xf32, #tpu.memory_space<vmem>>, vector<1x288x8xf32>
    %23 = vector.shape_cast %22 : vector<1x288x8xf32> to vector<288x8xf32>
    %24 = arith.truncf %23 : vector<288x8xf32> to vector<288x8xbf16>
    %c2 = arith.constant 2 : index
    %c0_12 = arith.constant 0 : index
    %c0_13 = arith.constant 0 : index
    %25 = vector.load %arg3[%c2, %c0_12, %c0_13] : memref<9x8x128xbf16, #tpu.memory_space<vmem>>, vector<1x8x128xbf16>
    %26 = vector.shape_cast %25 : vector<1x8x128xbf16> to vector<8x128xbf16>
    %cst_14 = arith.constant dense<0.000000e+00> : vector<288x128xf32>
    %27 = tpu.matmul %24, %26, %cst_14 {dimension_numbers = #tpu.dot_dimension_numbers<[1], [0], [0], [1], [0, 0, 1, 1], [], []>} : vector<288x8xbf16>, vector<8x128xbf16>, vector<288x128xf32> -> vector<288x128xf32>
    %28 = arith.addf %19, %27 : vector<288x128xf32>
    %c18_i32 = arith.constant 18 : i32
    %29 = arith.addi %0, %c18_i32 : i32
    %c0_15 = arith.constant 0 : index
    %30 = arith.index_cast %29 : i32 to index
    %c0_16 = arith.constant 0 : index
    %31 = vector.load %arg2[%c0_15, %30, %c0_16] : memref<1x328x8xf32, #tpu.memory_space<vmem>>, vector<1x288x8xf32>
    %32 = vector.shape_cast %31 : vector<1x288x8xf32> to vector<288x8xf32>
    %33 = arith.truncf %32 : vector<288x8xf32> to vector<288x8xbf16>
    %c3 = arith.constant 3 : index
    %c0_17 = arith.constant 0 : index
    %c0_18 = arith.constant 0 : index
    %34 = vector.load %arg3[%c3, %c0_17, %c0_18] : memref<9x8x128xbf16, #tpu.memory_space<vmem>>, vector<1x8x128xbf16>
    %35 = vector.shape_cast %34 : vector<1x8x128xbf16> to vector<8x128xbf16>
    %cst_19 = arith.constant dense<0.000000e+00> : vector<288x128xf32>
    %36 = tpu.matmul %33, %35, %cst_19 {dimension_numbers = #tpu.dot_dimension_numbers<[1], [0], [0], [1], [0, 0, 1, 1], [], []>} : vector<288x8xbf16>, vector<8x128xbf16>, vector<288x128xf32> -> vector<288x128xf32>
    %37 = arith.addf %28, %36 : vector<288x128xf32>
    %c19_i32 = arith.constant 19 : i32
    %38 = arith.addi %0, %c19_i32 : i32
    %c0_20 = arith.constant 0 : index
    %39 = arith.index_cast %38 : i32 to index
    %c0_21 = arith.constant 0 : index
    %40 = vector.load %arg2[%c0_20, %39, %c0_21] : memref<1x328x8xf32, #tpu.memory_space<vmem>>, vector<1x288x8xf32>
    %41 = vector.shape_cast %40 : vector<1x288x8xf32> to vector<288x8xf32>
    %42 = arith.truncf %41 : vector<288x8xf32> to vector<288x8xbf16>
    %c4 = arith.constant 4 : index
    %c0_22 = arith.constant 0 : index
    %c0_23 = arith.constant 0 : index
    %43 = vector.load %arg3[%c4, %c0_22, %c0_23] : memref<9x8x128xbf16, #tpu.memory_space<vmem>>, vector<1x8x128xbf16>
    %44 = vector.shape_cast %43 : vector<1x8x128xbf16> to vector<8x128xbf16>
    %cst_24 = arith.constant dense<0.000000e+00> : vector<288x128xf32>
    %45 = tpu.matmul %42, %44, %cst_24 {dimension_numbers = #tpu.dot_dimension_numbers<[1], [0], [0], [1], [0, 0, 1, 1], [], []>} : vector<288x8xbf16>, vector<8x128xbf16>, vector<288x128xf32> -> vector<288x128xf32>
    %46 = arith.addf %37, %45 : vector<288x128xf32>
    %c20_i32 = arith.constant 20 : i32
    %47 = arith.addi %0, %c20_i32 : i32
    %c0_25 = arith.constant 0 : index
    %48 = arith.index_cast %47 : i32 to index
    %c0_26 = arith.constant 0 : index
    %49 = vector.load %arg2[%c0_25, %48, %c0_26] : memref<1x328x8xf32, #tpu.memory_space<vmem>>, vector<1x288x8xf32>
    %50 = vector.shape_cast %49 : vector<1x288x8xf32> to vector<288x8xf32>
    %51 = arith.truncf %50 : vector<288x8xf32> to vector<288x8xbf16>
    %c5 = arith.constant 5 : index
    %c0_27 = arith.constant 0 : index
    %c0_28 = arith.constant 0 : index
    %52 = vector.load %arg3[%c5, %c0_27, %c0_28] : memref<9x8x128xbf16, #tpu.memory_space<vmem>>, vector<1x8x128xbf16>
    %53 = vector.shape_cast %52 : vector<1x8x128xbf16> to vector<8x128xbf16>
    %cst_29 = arith.constant dense<0.000000e+00> : vector<288x128xf32>
    %54 = tpu.matmul %51, %53, %cst_29 {dimension_numbers = #tpu.dot_dimension_numbers<[1], [0], [0], [1], [0, 0, 1, 1], [], []>} : vector<288x8xbf16>, vector<8x128xbf16>, vector<288x128xf32> -> vector<288x128xf32>
    %55 = arith.addf %46, %54 : vector<288x128xf32>
    %c36_i32 = arith.constant 36 : i32
    %56 = arith.addi %0, %c36_i32 : i32
    %c0_30 = arith.constant 0 : index
    %57 = arith.index_cast %56 : i32 to index
    %c0_31 = arith.constant 0 : index
    %58 = vector.load %arg2[%c0_30, %57, %c0_31] : memref<1x328x8xf32, #tpu.memory_space<vmem>>, vector<1x288x8xf32>
    %59 = vector.shape_cast %58 : vector<1x288x8xf32> to vector<288x8xf32>
    %60 = arith.truncf %59 : vector<288x8xf32> to vector<288x8xbf16>
    %c6 = arith.constant 6 : index
    %c0_32 = arith.constant 0 : index
    %c0_33 = arith.constant 0 : index
    %61 = vector.load %arg3[%c6, %c0_32, %c0_33] : memref<9x8x128xbf16, #tpu.memory_space<vmem>>, vector<1x8x128xbf16>
    %62 = vector.shape_cast %61 : vector<1x8x128xbf16> to vector<8x128xbf16>
    %cst_34 = arith.constant dense<0.000000e+00> : vector<288x128xf32>
    %63 = tpu.matmul %60, %62, %cst_34 {dimension_numbers = #tpu.dot_dimension_numbers<[1], [0], [0], [1], [0, 0, 1, 1], [], []>} : vector<288x8xbf16>, vector<8x128xbf16>, vector<288x128xf32> -> vector<288x128xf32>
    %64 = arith.addf %55, %63 : vector<288x128xf32>
    %c37_i32 = arith.constant 37 : i32
    %65 = arith.addi %0, %c37_i32 : i32
    %c0_35 = arith.constant 0 : index
    %66 = arith.index_cast %65 : i32 to index
    %c0_36 = arith.constant 0 : index
    %67 = vector.load %arg2[%c0_35, %66, %c0_36] : memref<1x328x8xf32, #tpu.memory_space<vmem>>, vector<1x288x8xf32>
    %68 = vector.shape_cast %67 : vector<1x288x8xf32> to vector<288x8xf32>
    %69 = arith.truncf %68 : vector<288x8xf32> to vector<288x8xbf16>
    %c7 = arith.constant 7 : index
    %c0_37 = arith.constant 0 : index
    %c0_38 = arith.constant 0 : index
    %70 = vector.load %arg3[%c7, %c0_37, %c0_38] : memref<9x8x128xbf16, #tpu.memory_space<vmem>>, vector<1x8x128xbf16>
    %71 = vector.shape_cast %70 : vector<1x8x128xbf16> to vector<8x128xbf16>
    %cst_39 = arith.constant dense<0.000000e+00> : vector<288x128xf32>
    %72 = tpu.matmul %69, %71, %cst_39 {dimension_numbers = #tpu.dot_dimension_numbers<[1], [0], [0], [1], [0, 0, 1, 1], [], []>} : vector<288x8xbf16>, vector<8x128xbf16>, vector<288x128xf32> -> vector<288x128xf32>
    %73 = arith.addf %64, %72 : vector<288x128xf32>
    %c38_i32 = arith.constant 38 : i32
    %74 = arith.addi %0, %c38_i32 : i32
    %c0_40 = arith.constant 0 : index
    %75 = arith.index_cast %74 : i32 to index
    %c0_41 = arith.constant 0 : index
    %76 = vector.load %arg2[%c0_40, %75, %c0_41] : memref<1x328x8xf32, #tpu.memory_space<vmem>>, vector<1x288x8xf32>
    %77 = vector.shape_cast %76 : vector<1x288x8xf32> to vector<288x8xf32>
    %78 = arith.truncf %77 : vector<288x8xf32> to vector<288x8xbf16>
    %c8 = arith.constant 8 : index
    %c0_42 = arith.constant 0 : index
    %c0_43 = arith.constant 0 : index
    %79 = vector.load %arg3[%c8, %c0_42, %c0_43] : memref<9x8x128xbf16, #tpu.memory_space<vmem>>, vector<1x8x128xbf16>
    %80 = vector.shape_cast %79 : vector<1x8x128xbf16> to vector<8x128xbf16>
    %cst_44 = arith.constant dense<0.000000e+00> : vector<288x128xf32>
    %81 = tpu.matmul %78, %80, %cst_44 {dimension_numbers = #tpu.dot_dimension_numbers<[1], [0], [0], [1], [0, 0, 1, 1], [], []>} : vector<288x8xbf16>, vector<8x128xbf16>, vector<288x128xf32> -> vector<288x128xf32>
    %82 = arith.addf %73, %81 : vector<288x128xf32>
    %c0_45 = arith.constant 0 : index
    %c0_46 = arith.constant 0 : index
    %83 = vector.load %arg4[%c0_45, %c0_46] : memref<1x128xf32, #tpu.memory_space<vmem>>, vector<1x128xf32>
    %84 = vector.broadcast %83 : vector<1x128xf32> to vector<288x128xf32>
    %85 = arith.addf %82, %84 : vector<288x128xf32>
    %cst_47 = arith.constant 0.000000e+00 : f32
    %86 = vector.broadcast %cst_47 : f32 to vector<288x128xf32>
    %87 = arith.maximumf %85, %86 : vector<288x128xf32>
    %c0_48 = arith.constant 0 : index
    %c0_49 = arith.constant 0 : index
    %c0_50 = arith.constant 0 : index
    %88 = vector.load %arg5[%c0_48, %c0_49, %c0_50] : memref<1x288x128xf32, #tpu.memory_space<vmem>>, vector<1x288x128xf32>
    %89 = vector.shape_cast %88 : vector<1x288x128xf32> to vector<288x128xf32>
    %90 = vector.shape_cast %87 : vector<288x128xf32> to vector<1x288x128xf32>
    tpu.vector_store %arg5[%c0_48, %c0_49, %c0_50], %90 {strides = array<i32>} : memref<1x288x128xf32, #tpu.memory_space<vmem>>, vector<1x288x128xf32>,
    return
  }
  func.func @transform_0(%arg0: i32, %arg1: i32) -> (i32, i32, i32) {
    %c0_i32 = arith.constant 0 : i32
    %c0_i32_0 = arith.constant 0 : i32
    %c0_i32_1 = arith.constant 0 : i32
    return %arg0, %c0_i32, %c0_i32_0 : i32, i32, i32
  }
  func.func @transform_1(%arg0: i32, %arg1: i32) -> (i32, i32, i32) {
    %c0_i32 = arith.constant 0 : i32
    %c0_i32_0 = arith.constant 0 : i32
    %c0_i32_1 = arith.constant 0 : i32
    %c0_i32_2 = arith.constant 0 : i32
    return %c0_i32, %c0_i32_0, %c0_i32_1 : i32, i32, i32
  }
  func.func @transform_2(%arg0: i32, %arg1: i32) -> (i32, i32) {
    %c0_i32 = arith.constant 0 : i32
    %c0_i32_0 = arith.constant 0 : i32
    %c0_i32_1 = arith.constant 0 : i32
    return %c0_i32, %c0_i32_0 : i32, i32
  }
  func.func @transform_3(%arg0: i32, %arg1: i32) -> (i32, i32, i32) {
    %c0_i32 = arith.constant 0 : i32
    %c0_i32_0 = arith.constant 0 : i32
    return %arg0, %arg1, %c0_i32 : i32, i32, i32
  }
}

</mosaic_0001>

<bundles_post_ra>
// kernel: tpu_custom_call.1
= control target key start
LH: loop header
LB: loop body
LE: loop exit
PB: predicated region body
PF: predicated region fallthrough
CT: control target
= control target key end

     0   :  { %8 = vsyncpa [#allocation3], 0  ;;  %s5594_s0 = inlined_call_operand.vmem [shape: f32[2,328,8], index: 0, kind: input, shape index: {}]   ;;  %s5595_s1 = inlined_call_operand.vmem [shape: bf16[9,8,128], index: 1, kind: input, shape index: {}]   ;;  %s5596_s2 = inlined_call_operand.vmem [shape: f32[1,128], index: 2, kind: input, shape index: {}]   ;;  %s5597_s3 = inlined_call_operand.hbm [shape: f32[2,288,128], index: 3, kind: output, shape index: {}]  }
   0x1   :  { %10 = vsyncpa [#allocation3 + $0x1], 0  ;;  %s4740_s12 = smov 0   ;;  %s4742_s13 = smov 0  }
   0x2   :  { %s4744_s14 = smov 0   ;;  %s4746_s15 = smov 0  }
   0x3   :  { %s4748_s16 = smov 0   ;;  %s4750_s17 = smov 0  }
   0x4 LB: > { %s3296_s18 = sadd.s32 4294967295, %s4715_s17   ;;  %s3297_s19 = sadd.s32 4294967294, %s4715_s17   ;;  %s4715_s17 = sphi %s4750_s17, %s16_s17   ;;  %s4711_s16 = sphi %s4748_s16, %s5604_s16   ;;  %s4707_s15 = sphi %s4746_s15, %s5603_s15   ;;  %s4703_s14 = sphi %s4744_s14, %s5602_s14   ;;  %s4699_s13 = sphi %s4742_s13, %s5601_s13   ;;  %s4695_s12 = sphi %s4740_s12, %s5600_s12  }
   0x5   : > { %s28_s20 = sadd.s32 1, %s4711_s16  ;;  %s105_s21 = sadd.s32 1, %s4703_s14 }
   0x6   : > { %p30_p0 = scmp.ge.s32.totalorder %s28_s20, 2  ;;  %p115_p1 = scmp.ne.s32.totalorder %s4703_s14, %s4699_s13 }
   0x7   : > { %p116_p2 = scmp.eq.s32.totalorder %s3296_s18, 1  ;;  %p121_p3 = scmp.ne.s32.totalorder %s4699_s13, %s4695_s12 }
   0x8   : > { %s5606_s20 = smov (%p30_p0, %s28_s20), 0  ;;  %p122_p5 = scmp.eq.s32.totalorder %s3297_s19, 1 }
   0x9   : > { %p4780_p4 = por %p116_p2, %p115_p1  ;;  %s100_s23 = ssub.s32 %s4711_s16, %s5606_s20 }
   0xa   : > { %p3300_p6 = scmp.ge.s32.totalorder %s4715_s17, 1  ;;  %p103_p7 = scmp.eq.s32.totalorder %s100_s23, 0 }
   0xb   : > { %p4787_p8 = por %p122_p5, %p121_p3  ;;  %p154_p9 = scmp.lt.s32.totalorder %s4715_s17, 3 }
   0xc   : > { %s4793_s25 = scalar_select %p103_p7, %s4703_s14, %s105_s21  }
   0xd   : > { %p155_p10 = pnand %p3300_p6, %p154_p9 }
   0xe   : > { %vm355_vm0 = vcmask (!%p155_p10), 1043456   ;;  %v4798_v0 = vld [vmem:[%s5595_s1 + $0x10] sm:$0xf] (!%p155_p10)  ;;  %v3338_v1 = vld [vmem:[%s5595_s1 + $0x4] sm:$0xf] (!%p155_p10)  ;;  %p178_p11 = scmp.lt.s32.totalorder (!%p155_p10), %s4707_s15, 1 }
   0xf   : > { %158 = sbr.rel (%p155_p10) target bundleno = 588 (0x24c), region = 32  ;;  %4571 = vmatprep.subr.msk.bf16.mxu0 (!%p155_p10), %vm355_vm0, %v4798_v0  ;;  %4567 = vmatprep.subr.msk.bf16.mxu1 (!%p155_p10), %vm355_vm0, %v3338_v1  ;;  %v4809_v2 = vsel (!%p155_p10), %vm355_vm0, %v4798_v0, 0  ;;  %v357_v3 = vsel (!%p155_p10), %vm355_vm0, %v3338_v1, 0  ;;  %v3576_v4 = vld [vmem:[%s5595_s1 + $0x14] sm:$0xf] (!%p155_p10)  ;;  %vm300_vm1 = vcmask (!%p155_p10), 64512  }
  0x10   : > { %4088 = vmatpush3.bf16.msra.mxu0 (!%p155_p10), %v4809_v2  ;;  %3936 = vmatpush3.bf16.msra.mxu1 (!%p155_p10), %v357_v3  ;;  %v241_v5 = vld [vmem:[%s5595_s1] sm:$0xf] (!%p155_p10)  ;;  %v1867_v20 = vsel (!%p155_p10), %vm355_vm0, %v3576_v4, 0  ;;  %v4847_v26 = vld [vmem:[%s5595_s1 + $0x18] sm:$0xf] (!%p155_p10)  ;;  %s4579_s10 = smul.u32 (!%p155_p10), 4608, %s4707_s15 }
  0x11   : > { %4573 = vmatprep.subr.msk.bf16.mxu0 (!%p155_p10), %vm355_vm0, %v3576_v4  ;;  %4568 = vmatprep.subr.msk.bf16.mxu1 (!%p155_p10), %vm355_vm0, %v241_v5  ;;  %v591_v18 = vsel (!%p155_p10), %vm355_vm0, %v241_v5, 0  ;;  %v4852_v27 = vld [vmem:[%s5595_s1 + $0x8] sm:$0xf] (!%p155_p10)  ;;  %s4717_s26 = smov (!%p155_p10), [#allocation2]  }
  0x12   : > { %s5539_s21 = scalar_lea.hbm (!%p155_p10), %s5597_s3, %s4579_s10  ;;  %s4641_s27 = sshll.u32 (!%p155_p10), %s4717_s26, 4  ;;  %s4642_s27 = int_to_ptr.vmem [resolvable:$false] %s4641_s27 }
  0x13   : > { %s4643_s28 = scalar_lea.vmem (!%p155_p10), %s4642_s27, 9216 }
  0x16   : > { %s179_s5 = scalar_select %p178_p11, %s4707_s15, 1 }
  0x18   : > { %s4578_s8 = smul.u32 328, %s179_s5  ;;  %s175_s5 = sand.u32 1, %s4699_s13  }
  0x19   : > { %s4577_s6 = smul.u32 288, %s175_s5  ;;  %s5548_s15 = scalar_lea.sflag [#allocation3], %s175_s5 }
  0x1a   : > { %s4825_s11 = scalar_lea.vmem %s5594_s0, %s4578_s8 }
  0x1b   : > { %v3302_v6 = vld [vmem:[%s4825_s11 + $0x1] sm:$0xff]  ;;  %v3303_v7 = vld [vmem:[%s4825_s11 + $0x9] sm:$0xff]  ;;  %v3485_v8 = vld [vmem:[%s4825_s11 + $0x13] sm:$0xff]  ;;  %s5459_s9 = scalar_lea.vmem [#allocation2], %s4577_s6 }
  0x1c   : > { %v280_v9 = vpack.c.bf16 %v3303_v7, %v3302_v6  ;;  %v3486_v10 = vld [vmem:[%s4825_s11 + $0x1b] sm:$0xff]  ;;  %v3304_v11 = vld [vmem:[%s4825_s11 + $0x11] sm:$0xff]  ;;  %v3487_v15 = vld [vmem:[%s4825_s11 + $0x23] sm:$0xff] }
  0x1d   : > { %v3305_v12 = vld [vmem:[%s4825_s11 + $0x19] sm:$0xff]  ;;  %v1464_v13 = vpack.c.bf16 %v3486_v10, %v3485_v8  ;;  %v3488_v16 = vld [vmem:[%s4825_s11 + $0x2b] sm:$0xff]  ;;  %v3306_v17 = vld [vmem:[%s4825_s11 + $0x21] sm:$0xff] }
  0x1e   : > { %v281_v14 = vpack.c.bf16 %v3305_v12, %v3304_v11  ;;  %3937 = vmatprep.mubr.msk.bf16.mxu1 %vm300_vm1, %v280_v9  ;;  %v1465_v19 = vpack.c.bf16 %v3488_v16, %v3487_v15  ;;  %v3307_v21 = vld [vmem:[%s4825_s11 + $0x29] sm:$0xff]  ;;  %v3489_v22 = vld [vmem:[%s4825_s11 + $0x33] sm:$0xff]  ;;  %v3490_v23 = vld [vmem:[%s4825_s11 + $0x3b] sm:$0xff] }
  0x1f   : > { %4089 = vmatprep.mubr.msk.bf16.mxu0 %vm300_vm1, %v1464_v13  ;;  %v282_v24 = vpack.c.bf16 %v3307_v21, %v3306_v17  ;;  %v1466_v25 = vpack.c.bf16 %v3490_v23, %v3489_v22  ;;  %v3308_v28 = vld [vmem:[%s4825_s11 + $0x31] sm:$0xff]  ;;  %v3309_v29 = vld [vmem:[%s4825_s11 + $0x39] sm:$0xff]  ;;  %v3491_v30 = vld [vmem:[%s4825_s11 + $0x43] sm:$0xff] }
  0x20   : > { %3938 = vmatmul.mubr.msk.bf16.vlgmr.msra.gmra.mrb[0].mxu1 %vm300_vm1, %v281_v14  ;;  %4090 = vmatmul.mubr.msk.bf16.vlgmr.msra.gmra.mrb[0].mxu0 %vm300_vm1, %v1465_v19  ;;  %v3492_v31 = vld [vmem:[%s4825_s11 + $0x4b] sm:$0xff]  ;;  %v3310_v32 = vld [vmem:[%s4825_s11 + $0x41] sm:$0xff]  ;;  %v3493_v34 = vld [vmem:[%s4825_s11 + $0x53] sm:$0xff]  ;;  %v283_v36 = vpack.c.bf16 %v3309_v29, %v3308_v28  ;;  %v2195_v28 = vsel %vm355_vm0, %v4847_v26, 0 }
  0x21   : > { %3974 = vmatpush3.bf16.msra.mxu1 %v591_v18  ;;  %4126 = vmatpush3.bf16.msra.mxu0 %v1867_v20  ;;  %v3311_v33 = vld [vmem:[%s4825_s11 + $0x49] sm:$0xff]  ;;  %v3494_v35 = vld [vmem:[%s4825_s11 + $0x5b] sm:$0xff]  ;;  %v1467_v37 = vpack.c.bf16 %v3492_v31, %v3491_v30  ;;  %v3312_v40 = vld [vmem:[%s4825_s11 + $0x51] sm:$0xff] }
  0x22   : > { %3941 = vmatprep.mubr.msk.bf16.mxu1 %vm300_vm1, %v282_v24  ;;  %4093 = vmatprep.mubr.msk.bf16.mxu0 %vm300_vm1, %v1466_v25  ;;  %v284_v38 = vpack.c.bf16 %v3311_v33, %v3310_v32  ;;  %v1468_v39 = vpack.c.bf16 %v3494_v35, %v3493_v34  ;;  %v3313_v41 = vld [vmem:[%s4825_s11 + $0x59] sm:$0xff]  ;;  %v3495_v42 = vld [vmem:[%s4825_s11 + $0x63] sm:$0xff]  ;;  %v3496_v43 = vld [vmem:[%s4825_s11 + $0x6b] sm:$0xff] }
  0x23   : > { %4574 = vmatprep.subr.msk.bf16.mxu0 %vm355_vm0, %v4847_v26  ;;  %4569 = vmatprep.subr.msk.bf16.mxu1 %vm355_vm0, %v4852_v27  ;;  %v3314_v44 = vld [vmem:[%s4825_s11 + $0x61] sm:$0xff]  ;;  %v3315_v45 = vld [vmem:[%s4825_s11 + $0x69] sm:$0xff]  ;;  %v3497_v46 = vld [vmem:[%s4825_s11 + $0x73] sm:$0xff]  ;;  %v285_v48 = vpack.c.bf16 %v3313_v41, %v3312_v40  ;;  %v1469_v49 = vpack.c.bf16 %v3496_v43, %v3495_v42 }
  0x24   : > { %v3498_v47 = vld [vmem:[%s4825_s11 + $0x7b] sm:$0xff]  ;;  %v286_v50 = vpack.c.bf16 %v3315_v45, %v3314_v44  ;;  %v3316_v52 = vld [vmem:[%s4825_s11 + $0x71] sm:$0xff]  ;;  %v3499_v54 = vld [vmem:[%s4825_s11 + $0x83] sm:$0xff] }
  0x25   : > { %v1470_v51 = vpack.c.bf16 %v3498_v47, %v3497_v46  ;;  %v3317_v53 = vld [vmem:[%s4825_s11 + $0x79] sm:$0xff]  ;;  %v3500_v55 = vld [vmem:[%s4825_s11 + $0x8b] sm:$0xff]  ;;  %v3318_v56 = vld [vmem:[%s4825_s11 + $0x81] sm:$0xff] }
  0x26   : > { %v3319_v57 = vld [vmem:[%s4825_s11 + $0x89] sm:$0xff]  ;;  %v3501_v58 = vld [vmem:[%s4825_s11 + $0x93] sm:$0xff]  ;;  %v3502_v59 = vld [vmem:[%s4825_s11 + $0x9b] sm:$0xff]  ;;  %v287_v60 = vpack.c.bf16 %v3317_v53, %v3316_v52  ;;  %v1471_v61 = vpack.c.bf16 %v3500_v55, %v3499_v54 }
  0x27   : > { %v288_v62 = vpack.c.bf16 %v3319_v57, %v3318_v56  ;;  %v1472_v63 = vpack.c.bf16 %v3502_v59, %v3501_v58  ;;  %v3320_v1 = vld [vmem:[%s4825_s11 + $0x91] sm:$0xff]  ;;  %v3321_v3 = vld [vmem:[%s4825_s11 + $0x99] sm:$0xff]  ;;  %v3503_v4 = vld [vmem:[%s4825_s11 + $0xa3] sm:$0xff] }
  0x28   : > { %3942 = vmatmul.mubr.msk.bf16.gmra.mrb[4].mxu1 %vm300_vm1, %v283_v36  ;;  %4094 = vmatmul.mubr.msk.bf16.gmra.mrb[4].mxu0 %vm300_vm1, %v1467_v37  ;;  %v3504_v5 = vld [vmem:[%s4825_s11 + $0xab] sm:$0xff]  ;;  %v3322_v6 = vld [vmem:[%s4825_s11 + $0xa1] sm:$0xff]  ;;  %v3540_v8 = vld [vmem:[%s4825_s11 + $0x14] sm:$0xff]  ;;  %v289_v10 = vpack.c.bf16 %v3321_v3, %v3320_v1 }
  0x29   : > { %3945 = vmatprep.mubr.msk.bf16.mxu1 %vm300_vm1, %v284_v38  ;;  %4097 = vmatprep.mubr.msk.bf16.mxu0 %vm300_vm1, %v1468_v39  ;;  %v3323_v7 = vld [vmem:[%s4825_s11 + $0xa9] sm:$0xff]  ;;  %v3541_v9 = vld [vmem:[%s4825_s11 + $0x1c] sm:$0xff]  ;;  %v1473_v11 = vpack.c.bf16 %v3504_v5, %v3503_v4  ;;  %v3324_v14 = vld [vmem:[%s4825_s11 + $0xb1] sm:$0xff] }
  0x2a   : > { %v290_v12 = vpack.c.bf16 %v3323_v7, %v3322_v6  ;;  %v1792_v13 = vpack.c.bf16 %v3541_v9, %v3540_v8  ;;  %v3325_v15 = vld [vmem:[%s4825_s11 + $0xb9] sm:$0xff]  ;;  %v3542_v16 = vld [vmem:[%s4825_s11 + $0x24] sm:$0xff]  ;;  %v3543_v17 = vld [vmem:[%s4825_s11 + $0x2c] sm:$0xff] }
  0x2b   : > { %v3326_v18 = vld [vmem:[%s4825_s11 + $0xc1] sm:$0xff]  ;;  %v3327_v19 = vld [vmem:[%s4825_s11 + $0xc9] sm:$0xff]  ;;  %v3544_v20 = vld [vmem:[%s4825_s11 + $0x34] sm:$0xff]  ;;  %v291_v22 = vpack.c.bf16 %v3325_v15, %v3324_v14  ;;  %v4917_v23 = vpack.c.bf16 %v3543_v17, %v3542_v16  ;;  %v883_v15 = vsel %vm355_vm0, %v4852_v27, 0 }
  0x2c   : > { %v3545_v21 = vld [vmem:[%s4825_s11 + $0x3c] sm:$0xff]  ;;  %v292_v24 = vpack.c.bf16 %v3327_v19, %v3326_v18  ;;  %v3328_v30 = vld [vmem:[%s4825_s11 + $0xd1] sm:$0xff]  ;;  %v3546_v32 = vld [vmem:[%s4825_s11 + $0x44] sm:$0xff] }
  0x2d   : > { %v4919_v25 = vpack.c.bf16 %v3545_v21, %v3544_v20  ;;  %v4927_v29 = vld [vmem:[%s5595_s1 + $0x1c] sm:$0xf]  ;;  %v3547_v26 = vld [vmem:[%s4825_s11 + $0x4c] sm:$0xff]  ;;  %v3330_v33 = vld [vmem:[%s4825_s11 + $0xe1] sm:$0xff] }
  0x2e   : > { %v3329_v31 = vld [vmem:[%s4825_s11 + $0xd9] sm:$0xff]  ;;  %v3331_v34 = vld [vmem:[%s4825_s11 + $0xe9] sm:$0xff]  ;;  %v4944_v38 = vpack.c.bf16 %v3547_v26, %v3546_v32  ;;  %v3332_v41 = vld [vmem:[%s4825_s11 + $0xf1] sm:$0xff] }
  0x2f   : > { %v3548_v35 = vld [vmem:[%s4825_s11 + $0x54] sm:$0xff]  ;;  %v3549_v36 = vld [vmem:[%s4825_s11 + $0x5c] sm:$0xff]  ;;  %v293_v37 = vpack.c.bf16 %v3329_v31, %v3328_v30  ;;  %v294_v39 = vpack.c.bf16 %v3331_v34, %v3330_v33  ;;  %v3550_v43 = vld [vmem:[%s4825_s11 + $0x64] sm:$0xff] }
  0x30   : > { %3946 = vmatmul.mubr.msk.bf16.gmra.mrb[8].mxu1 %vm300_vm1, %v285_v48  ;;  %4098 = vmatmul.mubr.msk.bf16.gmra.mrb[8].mxu0 %vm300_vm1, %v1469_v49  ;;  %v4946_v40 = vpack.c.bf16 %v3549_v36, %v3548_v35  ;;  %v3333_v42 = vld [vmem:[%s4825_s11 + $0xf9] sm:$0xff]  ;;  %v3551_v44 = vld [vmem:[%s4825_s11 + $0x6c] sm:$0xff]  ;;  %v3334_v45 = vld [vmem:[%s4825_s11 + $0x101] sm:$0xff] }
  0x31   : > { %3949 = vmatprep.mubr.msk.bf16.mxu1 %vm300_vm1, %v286_v50  ;;  %4101 = vmatprep.mubr.msk.bf16.mxu0 %vm300_vm1, %v1470_v51  ;;  %v3335_v46 = vld [vmem:[%s4825_s11 + $0x109] sm:$0xff]  ;;  %v3552_v47 = vld [vmem:[%s4825_s11 + $0x74] sm:$0xff]  ;;  %v3553_v48 = vld [vmem:[%s4825_s11 + $0x7c] sm:$0xff]  ;;  %v295_v49 = vpack.c.bf16 %v3333_v42, %v3332_v41  ;;  %v4962_v50 = vpack.c.bf16 %v3551_v44, %v3550_v43 }
  0x32   : > { %v296_v51 = vpack.c.bf16 %v3335_v46, %v3334_v45  ;;  %v4964_v52 = vpack.c.bf16 %v3553_v48, %v3552_v47  ;;  %v3336_v53 = vld [vmem:[%s4825_s11 + $0x111] sm:$0xff]  ;;  %v3337_v54 = vld [vmem:[%s4825_s11 + $0x119] sm:$0xff]  ;;  %v3554_v55 = vld [vmem:[%s4825_s11 + $0x84] sm:$0xff] }
  0x33   : > { %v3555_v56 = vld [vmem:[%s4825_s11 + $0x8c] sm:$0xff]  ;;  %v187_v57 = vld [vmem:[%s4825_s11] sm:$0xff]  ;;  %v3556_v59 = vld [vmem:[%s4825_s11 + $0x94] sm:$0xff] }
  0x34   : > { %v188_v58 = vld [vmem:[%s4825_s11 + $0x8] sm:$0xff]  ;;  %v189_v3 = vld [vmem:[%s4825_s11 + $0x10] sm:$0xff]  ;;  %v190_v4 = vld [vmem:[%s4825_s11 + $0x18] sm:$0xff] }
  0x35   : > { %v3558_v5 = vld [vmem:[%s4825_s11 + $0xa4] sm:$0xff]  ;;  %v3559_v6 = vld [vmem:[%s4825_s11 + $0xac] sm:$0xff]  ;;  %v3560_v9 = vld [vmem:[%s4825_s11 + $0xb4] sm:$0xff] }
  0x36   : > { %v191_v7 = vld [vmem:[%s4825_s11 + $0x20] sm:$0xff]  ;;  %v192_v8 = vld [vmem:[%s4825_s11 + $0x28] sm:$0xff]  ;;  %v193_v17 = vld [vmem:[%s4825_s11 + $0x30] sm:$0xff] }
  0x37   : > { %v5008_v16 = vld [vmem:[%s5595_s1 + $0xc] sm:$0xf]  ;;  %v194_v18 = vld [vmem:[%s4825_s11 + $0x38] sm:$0xff]  ;;  %v3562_v19 = vld [vmem:[%s4825_s11 + $0xc4] sm:$0xff] }
  0x38   : > { %3950 = vmatmul.mubr.msk.bf16.gmra.mrb[12].mxu1 %vm300_vm1, %v287_v60  ;;  %4102 = vmatmul.mubr.msk.bf16.gmra.mrb[12].mxu0 %vm300_vm1, %v1471_v61  ;;  %v3557_v60 = vld [vmem:[%s4825_s11 + $0x9c] sm:$0xff]  ;;  %v297_v61 = vpack.c.bf16 %v3337_v54, %v3336_v53  ;;  %v3563_v27 = vld [vmem:[%s4825_s11 + $0xcc] sm:$0xff]  ;;  %v3566_v34 = vld [vmem:[%s4825_s11 + $0xe4] sm:$0xff] }
  0x39   : > { %3953 = vmatprep.mubr.msk.bf16.mxu1 %vm300_vm1, %v288_v62  ;;  %4105 = vmatprep.mubr.msk.bf16.mxu0 %vm300_vm1, %v1472_v63  ;;  %v4980_v62 = vpack.c.bf16 %v3555_v56, %v3554_v55  ;;  %v223_v63 = vpack.c.bf16 %v188_v58, %v187_v57  ;;  %v4982_v1 = vpack.c.bf16 %v3557_v60, %v3556_v59  ;;  %v195_v20 = vld [vmem:[%s4825_s11 + $0x40] sm:$0xff]  ;;  %v196_v21 = vld [vmem:[%s4825_s11 + $0x48] sm:$0xff]  ;;  %v197_v26 = vld [vmem:[%s4825_s11 + $0x50] sm:$0xff] }
  0x3a   : > { %v5025_v30 = vpack.c.bf16 %v3563_v27, %v3562_v19  ;;  %v227_v31 = vpack.c.bf16 %v196_v21, %v195_v20  ;;  %v198_v33 = vld [vmem:[%s4825_s11 + $0x58] sm:$0xff]  ;;  %v3567_v35 = vld [vmem:[%s4825_s11 + $0xec] sm:$0xff]  ;;  %v199_v36 = vld [vmem:[%s4825_s11 + $0x60] sm:$0xff] }
  0x3b   : > { %v3569_v41 = vld [vmem:[%s4825_s11 + $0xfc] sm:$0xff]  ;;  %v228_v42 = vpack.c.bf16 %v198_v33, %v197_v26  ;;  %v5043_v43 = vpack.c.bf16 %v3567_v35, %v3566_v34  ;;  %v201_v46 = vld [vmem:[%s4825_s11 + $0x70] sm:$0xff]  ;;  %v3570_v48 = vld [vmem:[%s4825_s11 + $0x104] sm:$0xff] }
  0x3c   : > { %v202_v47 = vld [vmem:[%s4825_s11 + $0x78] sm:$0xff]  ;;  %v204_v53 = vld [vmem:[%s4825_s11 + $0x88] sm:$0xff]  ;;  %v205_v60 = vld [vmem:[%s4825_s11 + $0x90] sm:$0xff] }
  0x3d   : > { %v3572_v54 = vld [vmem:[%s4825_s11 + $0x114] sm:$0xff]  ;;  %v3573_v55 = vld [vmem:[%s4825_s11 + $0x11c] sm:$0xff]  ;;  %v230_v56 = vpack.c.bf16 %v202_v47, %v201_v46  ;;  %v216_v20 = vld [vmem:[%s4825_s11 + $0xe8] sm:$0xff] }
  0x3e   : > { %v5063_v59 = vpack.c.bf16 %v3573_v55, %v3572_v54  ;;  %v5095_v19 = vld [vmem:[%s5595_s1 + $0x20] sm:$0xf]  ;;  %v214_v27 = vld [vmem:[%s4825_s11 + $0xd8] sm:$0xff]  ;;  %v3376_v34 = vld [vmem:[%s4825_s11 + $0xa] sm:$0xff] }
  0x3f   : > { %v222_v33 = vld [vmem:[%s4825_s11 + $0x118] sm:$0xff]  ;;  %v3384_v46 = vld [vmem:[%s4825_s11 + $0x4a] sm:$0xff]  ;;  %v3391_v54 = vld [vmem:[%s4825_s11 + $0x82] sm:$0xff] }
  0x40   : > { %3954 = vmatmul.mubr.msk.bf16.gmra.mrb[16].mxu1 %vm300_vm1, %v289_v10  ;;  %4106 = vmatmul.mubr.msk.bf16.gmra.mrb[16].mxu0 %vm300_vm1, %v1473_v11  ;;  %v3561_v10 = vld [vmem:[%s4825_s11 + $0xbc] sm:$0xff]  ;;  %v224_v11 = vpack.c.bf16 %v190_v4, %v189_v3  ;;  %v3575_v3 = vld [vmem:[%s4825_s11 + $0x12c] sm:$0xff] }
  0x41   : > { %3957 = vmatprep.mubr.msk.bf16.mxu1 %vm300_vm1, %v290_v12  ;;  %4127 = vmatprep.mubr.msk.bf16.mxu0 %vm300_vm1, %v1792_v13  ;;  %v4998_v12 = vpack.c.bf16 %v3559_v6, %v3558_v5  ;;  %v225_v13 = vpack.c.bf16 %v192_v8, %v191_v7  ;;  %v5000_v14 = vpack.c.bf16 %v3561_v10, %v3560_v9  ;;  %v207_v4 = vld [vmem:[%s4825_s11 + $0xa0] sm:$0xff]  ;;  %v208_v5 = vld [vmem:[%s4825_s11 + $0xa8] sm:$0xff]  ;;  %v209_v9 = vld [vmem:[%s4825_s11 + $0xb0] sm:$0xff] }
  0x42   : > { %v233_v8 = vpack.c.bf16 %v208_v5, %v207_v4  ;;  %v210_v10 = vld [vmem:[%s4825_s11 + $0xb8] sm:$0xff]  ;;  %v3392_v55 = vld [vmem:[%s4825_s11 + $0x8a] sm:$0xff] }
  0x43   : > { %v3650_v4 = vld [vmem:[%s4825_s11 + $0x25] sm:$0xff] }
  0x48   : > { %3958 = vmatmul.mubr.msk.bf16.gmra.mrb[20].mxu1 %vm300_vm1, %v291_v22  ;;  %4128 = vmatmul.mubr.msk.bf16.vlgmr.msra.gmra.mrb[0].mxu0 %vm300_vm1, %v4917_v23  ;;  %v3564_v22 = vld [vmem:[%s4825_s11 + $0xd4] sm:$0xff] }
  0x49   : > { %3961 = vmatprep.mubr.msk.bf16.mxu1 %vm300_vm1, %v292_v24  ;;  %4164 = vmatpush3.bf16.msra.mxu0 %v2195_v28  ;;  %v3565_v24 = vld [vmem:[%s4825_s11 + $0xdc] sm:$0xff]  ;;  %v226_v28 = vpack.c.bf16 %v194_v18, %v193_v17  ;;  %v2523_v18 = vsel %vm355_vm0, %v4927_v29, 0 }
  0x4a   : > { %4131 = vmatprep.mubr.msk.bf16.mxu0 %vm300_vm1, %v4919_v25  ;;  %4575 = vmatprep.subr.msk.bf16.mxu0 %vm355_vm0, %v4927_v29  ;;  %v5027_v32 = vpack.c.bf16 %v3565_v24, %v3564_v22  ;;  %v215_v29 = vld [vmem:[%s4825_s11 + $0xe0] sm:$0xff] }
  0x4b   : > { %v237_v22 = vpack.c.bf16 %v216_v20, %v215_v29  ;;  %v219_v24 = vld [vmem:[%s4825_s11 + $0x100] sm:$0xff] }
  0x50   : > { %3962 = vmatmul.mubr.msk.bf16.gmra.mrb[24].mxu1 %vm300_vm1, %v293_v37  ;;  %4132 = vmatmul.mubr.msk.bf16.gmra.mrb[4].mxu0 %vm300_vm1, %v4944_v38  ;;  %v200_v37 = vld [vmem:[%s4825_s11 + $0x68] sm:$0xff] }
  0x51   : > { %3965 = vmatprep.mubr.msk.bf16.mxu1 %vm300_vm1, %v294_v39  ;;  %4135 = vmatprep.mubr.msk.bf16.mxu0 %vm300_vm1, %v4946_v40  ;;  %v3568_v39 = vld [vmem:[%s4825_s11 + $0xf4] sm:$0xff]  ;;  %v229_v44 = vpack.c.bf16 %v200_v37, %v199_v36 }
  0x52   : > { %v5045_v45 = vpack.c.bf16 %v3569_v41, %v3568_v39  ;;  %v3378_v37 = vld [vmem:[%s4825_s11 + $0x1a] sm:$0xff]  ;;  %v3380_v39 = vld [vmem:[%s4825_s11 + $0x2a] sm:$0xff] }
  0x58   : > { %3966 = vmatmul.mubr.msk.bf16.gmra.mrb[28].mxu1 %vm300_vm1, %v295_v49  ;;  %4136 = vmatmul.mubr.msk.bf16.gmra.mrb[8].mxu0 %vm300_vm1, %v4962_v50  ;;  %v3571_v49 = vld [vmem:[%s4825_s11 + $0x10c] sm:$0xff] }
  0x59   : > { %3969 = vmatprep.mubr.msk.bf16.mxu1 %vm300_vm1, %v296_v51  ;;  %4139 = vmatprep.mubr.msk.bf16.mxu0 %vm300_vm1, %v4964_v52  ;;  %v203_v51 = vld [vmem:[%s4825_s11 + $0x80] sm:$0xff]  ;;  %v5061_v57 = vpack.c.bf16 %v3571_v49, %v3570_v48  ;;  %v3388_v49 = vld [vmem:[%s4825_s11 + $0x6a] sm:$0xff] }
  0x5a   : > { %v231_v58 = vpack.c.bf16 %v204_v53, %v203_v51  ;;  %v3386_v48 = vld [vmem:[%s4825_s11 + $0x5a] sm:$0xff] }
  0x60   : > { %3970 = vmatmul.mubr.msk.bf16.gmra.mrb[32].mxu1 %vm300_vm1, %v297_v61  ;;  %4140 = vmatmul.mubr.msk.bf16.gmra.mrb[12].mxu0 %vm300_vm1, %v4980_v62  ;;  %v206_v61 = vld [vmem:[%s4825_s11 + $0x98] sm:$0xff] }
  0x61   : > { %3975 = vmatprep.mubr.msk.bf16.mxu1 %vm300_vm1, %v223_v63  ;;  %4143 = vmatprep.mubr.msk.bf16.mxu0 %vm300_vm1, %v4982_v1  ;;  %v3574_v63 = vld [vmem:[%s4825_s11 + $0x124] sm:$0xff]  ;;  %v232_v6 = vpack.c.bf16 %v206_v61, %v205_v60  ;;  %v3394_v60 = vld [vmem:[%s4825_s11 + $0x9a] sm:$0xff] }
  0x62   : > { %v5077_v7 = vpack.c.bf16 %v3575_v3, %v3574_v63  ;;  %v3630_v61 = vld [vmem:[%s4825_s11 + $0x13c] sm:$0xff]  ;;  %v3396_v3 = vld [vmem:[%s4825_s11 + $0xaa] sm:$0xff] }
  0x63   : > { %v3395_v63 = vld [vmem:[%s4825_s11 + $0xa2] sm:$0xff] }
  0x68   : > { %3976 = vmatmul.mubr.msk.bf16.vlgmr.msra.gmra.mrb[0].mxu1 %vm300_vm1, %v224_v11  ;;  %4144 = vmatmul.mubr.msk.bf16.gmra.mrb[16].mxu0 %vm300_vm1, %v4998_v12  ;;  %v211_v11 = vld [vmem:[%s4825_s11 + $0xc0] sm:$0xff] }
  0x69   : > { %3979 = vmatprep.mubr.msk.bf16.mxu1 %vm300_vm1, %v225_v13  ;;  %4147 = vmatprep.mubr.msk.bf16.mxu0 %vm300_vm1, %v5000_v14  ;;  %v212_v13 = vld [vmem:[%s4825_s11 + $0xc8] sm:$0xff] }
  0x6a   : > { %4012 = vmatpush3.bf16.msra.mxu1 %v883_v15  ;;  %v234_v15 = vpack.c.bf16 %v210_v10, %v209_v9  ;;  %v235_v17 = vpack.c.bf16 %v212_v13, %v211_v11  ;;  %v3398_v10 = vld [vmem:[%s4825_s11 + $0xba] sm:$0xff] }
  0x6b   : > { %4570 = vmatprep.subr.msk.bf16.mxu1 %vm355_vm0, %v5008_v16  ;;  %v3652_v11 = vld [vmem:[%s4825_s11 + $0x35] sm:$0xff]  ;;  %v3653_v13 = vld [vmem:[%s4825_s11 + $0x3d] sm:$0xff] }
  0x6c   : > { %v2449_v29 = vpack.c.bf16 %v3653_v13, %v3652_v11 }
  0x70   : > { %3980 = vmatmul.mubr.msk.bf16.gmra.mrb[4].mxu1 %vm300_vm1, %v226_v28  ;;  %4148 = vmatmul.mubr.msk.bf16.gmra.mrb[20].mxu0 %vm300_vm1, %v5025_v30  ;;  %v220_v28 = vld [vmem:[%s4825_s11 + $0x108] sm:$0xff] }
  0x71   : > { %3983 = vmatprep.mubr.msk.bf16.mxu1 %vm300_vm1, %v227_v31  ;;  %4151 = vmatprep.mubr.msk.bf16.mxu0 %vm300_vm1, %v5027_v32  ;;  %v239_v26 = vpack.c.bf16 %v220_v28, %v219_v24  ;;  %v3656_v24 = vld [vmem:[%s4825_s11 + $0x55] sm:$0xff]  ;;  %v3657_v28 = vld [vmem:[%s4825_s11 + $0x5d] sm:$0xff] }
  0x78   : > { %3984 = vmatmul.mubr.msk.bf16.gmra.mrb[8].mxu1 %vm300_vm1, %v228_v42  ;;  %4152 = vmatmul.mubr.msk.bf16.gmra.mrb[24].mxu0 %vm300_vm1, %v5043_v43 }
  0x79   : > { %3987 = vmatprep.mubr.msk.bf16.mxu1 %vm300_vm1, %v229_v44  ;;  %4155 = vmatprep.mubr.msk.bf16.mxu0 %vm300_vm1, %v5045_v45  ;;  %v1211_v44 = vsel %vm355_vm0, %v5008_v16, 0  ;;  %v3383_v16 = vld [vmem:[%s4825_s11 + $0x42] sm:$0xff] }
  0x80   : > { %3988 = vmatmul.mubr.msk.bf16.gmra.mrb[12].mxu1 %vm300_vm1, %v230_v56  ;;  %4156 = vmatmul.mubr.msk.bf16.gmra.mrb[28].mxu0 %vm300_vm1, %v5061_v57 }
  0x81   : > { %3991 = vmatprep.mubr.msk.bf16.mxu1 %vm300_vm1, %v231_v58  ;;  %4159 = vmatprep.mubr.msk.bf16.mxu0 %vm300_vm1, %v5063_v59  ;;  %v5192_v58 = vpack.c.bf16 %v3392_v55, %v3391_v54  ;;  %v3666_v54 = vld [vmem:[%s4825_s11 + $0xa5] sm:$0xff]  ;;  %v3667_v55 = vld [vmem:[%s4825_s11 + $0xad] sm:$0xff] }
  0x88   : > { %3992 = vmatmul.mubr.msk.bf16.gmra.mrb[16].mxu1 %vm300_vm1, %v232_v6  ;;  %4160 = vmatmul.mubr.msk.bf16.gmra.mrb[32].mxu0 %vm300_vm1, %v5077_v7 }
  0x89   : > { %3995 = vmatprep.mubr.msk.bf16.mxu1 %vm300_vm1, %v233_v8  ;;  %4165 = vmatprep.mubr.msk.bf16.mxu0 %vm300_vm1, %v4917_v23  ;;  %v213_v23 = vld [vmem:[%s4825_s11 + $0xd0] sm:$0xff]  ;;  %v5212_v8 = vpack.c.bf16 %v3396_v3, %v3395_v63  ;;  %v3669_v63 = vld [vmem:[%s4825_s11 + $0xbd] sm:$0xff]  ;;  %v3670_v3 = vld [vmem:[%s4825_s11 + $0xc5] sm:$0xff] }
  0x8a   : > { %v236_v21 = vpack.c.bf16 %v214_v27, %v213_v23  ;;  %v3655_v23 = vld [vmem:[%s4825_s11 + $0x4d] sm:$0xff] }
  0x90   : > { %3996 = vmatmul.mubr.msk.bf16.gmra.mrb[20].mxu1 %vm300_vm1, %v234_v15  ;;  %4166 = vmatmul.mubr.msk.bf16.vlgmr.msra.gmra.mrb[0].mxu0 %vm300_vm1, %v4919_v25  ;;  %v217_v25 = vld [vmem:[%s4825_s11 + $0xf0] sm:$0xff]  ;;  %v3399_v15 = vld [vmem:[%s4825_s11 + $0xc2] sm:$0xff] }
  0x91   : > { %3999 = vmatprep.mubr.msk.bf16.mxu1 %vm300_vm1, %v235_v17  ;;  %4202 = vmatpush3.bf16.msra.mxu0 %v2523_v18  ;;  %v3400_v17 = vld [vmem:[%s4825_s11 + $0xca] sm:$0xff] }
  0x92   : > { %4169 = vmatprep.mubr.msk.bf16.mxu0 %vm300_vm1, %v4944_v38  ;;  %4576 = vmatprep.subr.msk.bf16.mxu0 %vm355_vm0, %v5095_v19  ;;  %v218_v38 = vld [vmem:[%s4825_s11 + $0xf8] sm:$0xff]  ;;  %v3654_v18 = vld [vmem:[%s4825_s11 + $0x45] sm:$0xff]  ;;  %v5230_v20 = vpack.c.bf16 %v3400_v17, %v3399_v15  ;;  %v3679_v15 = vld [vmem:[%s4825_s11 + $0x10d] sm:$0xff] }
  0x93   : > { %v238_v31 = vpack.c.bf16 %v218_v38, %v217_v25  ;;  %v3401_v25 = vld [vmem:[%s4825_s11 + $0xd2] sm:$0xff]  ;;  %v3402_v38 = vld [vmem:[%s4825_s11 + $0xda] sm:$0xff] }
  0x98   : > { %4000 = vmatmul.mubr.msk.bf16.gmra.mrb[24].mxu1 %vm300_vm1, %v236_v21  ;;  %4170 = vmatmul.mubr.msk.bf16.gmra.mrb[4].mxu0 %vm300_vm1, %v4946_v40  ;;  %v221_v40 = vld [vmem:[%s4825_s11 + $0x110] sm:$0xff]  ;;  %v2450_v21 = vpack.c.bf16 %v3655_v23, %v3654_v18  ;;  %v3682_v23 = vld [vmem:[%s4825_s11 + $0x125] sm:$0xff] }
  0x99   : > { %4003 = vmatprep.mubr.msk.bf16.mxu1 %vm300_vm1, %v237_v22  ;;  %4173 = vmatprep.mubr.msk.bf16.mxu0 %vm300_vm1, %v4962_v50  ;;  %v3375_v50 = vld [vmem:[%s4825_s11 + $0x2] sm:$0xff]  ;;  %v240_v35 = vpack.c.bf16 %v222_v33, %v221_v40  ;;  %v2851_v22 = vsel %vm355_vm0, %v5095_v19, 0  ;;  %v3659_v40 = vld [vmem:[%s4825_s11 + $0x6d] sm:$0xff]  ;;  %v5248_v33 = vpack.c.bf16 %v3402_v38, %v3401_v25 }
  0x9a   : > { %v808_v36 = vpack.c.bf16 %v3376_v34, %v3375_v50  ;;  %v3403_v19 = vld [vmem:[%s4825_s11 + $0xe2] sm:$0xff]  ;;  %v2451_v50 = vpack.c.bf16 %v3657_v28, %v3656_v24  ;;  %v3706_v38 = vld [vmem:[%s4825_s11 + $0x2e] sm:$0xff] }
  0x9b   : > { %v3705_v25 = vld [vmem:[%s4825_s11 + $0x26] sm:$0xff] }
  0x9c   : > { %v2776_v28 = vpack.c.bf16 %v3706_v38, %v3705_v25  ;;  %v3733_v25 = vld [vmem:[%s4825_s11 + $0x106] sm:$0xff]  ;;  %v3734_v38 = vld [vmem:[%s4825_s11 + $0x10e] sm:$0xff] }
  0xa0   : > { %4004 = vmatmul.mubr.msk.bf16.gmra.mrb[28].mxu1 %vm300_vm1, %v238_v31  ;;  %4174 = vmatmul.mubr.msk.bf16.gmra.mrb[8].mxu0 %vm300_vm1, %v4964_v52  ;;  %v3377_v52 = vld [vmem:[%s4825_s11 + $0x12] sm:$0xff]  ;;  %v3404_v31 = vld [vmem:[%s4825_s11 + $0xea] sm:$0xff] }
  0xa1   : > { %4007 = vmatprep.mubr.msk.bf16.mxu1 %vm300_vm1, %v239_v26  ;;  %4177 = vmatprep.mubr.msk.bf16.mxu0 %vm300_vm1, %v4980_v62  ;;  %v3379_v62 = vld [vmem:[%s4825_s11 + $0x22] sm:$0xff]  ;;  %v5138_v41 = vpack.c.bf16 %v3378_v37, %v3377_v52  ;;  %v5250_v34 = vpack.c.bf16 %v3404_v31, %v3403_v19  ;;  %v3406_v52 = vld [vmem:[%s4825_s11 + $0xfa] sm:$0xff]  ;;  %v3710_v31 = vld [vmem:[%s4825_s11 + $0x4e] sm:$0xff] }
  0xa2   : > { %v5140_v42 = vpack.c.bf16 %v3380_v39, %v3379_v62  ;;  %v3658_v26 = vld [vmem:[%s4825_s11 + $0x65] sm:$0xff]  ;;  %v3660_v37 = vld [vmem:[%s4825_s11 + $0x75] sm:$0xff]  ;;  %v3661_v62 = vld [vmem:[%s4825_s11 + $0x7d] sm:$0xff] }
  0xa3   : > { %v3407_v39 = vld [vmem:[%s4825_s11 + $0x102] sm:$0xff] }
  0xa4   : > { %v3709_v19 = vld [vmem:[%s4825_s11 + $0x46] sm:$0xff] }
  0xa8   : > { %4008 = vmatmul.mubr.msk.bf16.gmra.mrb[32].mxu1 %vm300_vm1, %v240_v35  ;;  %4178 = vmatmul.mubr.msk.bf16.gmra.mrb[12].mxu0 %vm300_vm1, %v4982_v1  ;;  %v3381_v1 = vld [vmem:[%s4825_s11 + $0x32] sm:$0xff]  ;;  %v2452_v35 = vpack.c.bf16 %v3659_v40, %v3658_v26  ;;  %v2778_v40 = vpack.c.bf16 %v3710_v31, %v3709_v19  ;;  %v3519_v19 = vld [vmem:[%s4825_s11 + $0x123] sm:$0xff] }
  0xa9   : > { %4013 = vmatprep.mubr.msk.bf16.mxu1 %vm300_vm1, %v808_v36  ;;  %4181 = vmatprep.mubr.msk.bf16.mxu0 %vm300_vm1, %v4998_v12  ;;  %v3382_v12 = vld [vmem:[%s4825_s11 + $0x3a] sm:$0xff]  ;;  %v3405_v36 = vld [vmem:[%s4825_s11 + $0xf2] sm:$0xff] }
  0xaa   : > { %v5158_v47 = vpack.c.bf16 %v3382_v12, %v3381_v1  ;;  %v3662_v1 = vld [vmem:[%s4825_s11 + $0x85] sm:$0xff]  ;;  %v3663_v12 = vld [vmem:[%s4825_s11 + $0x8d] sm:$0xff] }
  0xab   : > { %v3520_v31 = vld [vmem:[%s4825_s11 + $0x12b] sm:$0xff] }
  0xb0   : > { %4014 = vmatmul.mubr.msk.bf16.vlgmr.msra.gmra.mrb[0].mxu1 %vm300_vm1, %v5138_v41  ;;  %4182 = vmatmul.mubr.msk.bf16.gmra.mrb[16].mxu0 %vm300_vm1, %v5000_v14  ;;  %v5160_v14 = vpack.c.bf16 %v3384_v46, %v3383_v16  ;;  %v5266_v16 = vpack.c.bf16 %v3406_v52, %v3405_v36  ;;  %v2453_v46 = vpack.c.bf16 %v3661_v62, %v3660_v37  ;;  %v3717_v37 = vld [vmem:[%s4825_s11 + $0x86] sm:$0xff]  ;;  %v3718_v62 = vld [vmem:[%s4825_s11 + $0x8e] sm:$0xff] }
  0xb1   : > { %4017 = vmatprep.mubr.msk.bf16.mxu1 %vm300_vm1, %v5140_v42  ;;  %4185 = vmatprep.mubr.msk.bf16.mxu0 %vm300_vm1, %v5025_v30  ;;  %v3385_v30 = vld [vmem:[%s4825_s11 + $0x52] sm:$0xff] }
  0xb2   : > { %4050 = vmatpush3.bf16.msra.mxu1 %v1211_v44  ;;  %v5174_v51 = vpack.c.bf16 %v3386_v48, %v3385_v30  ;;  %v3408_v44 = vld [vmem:[%s4825_s11 + $0x10a] sm:$0xff]  ;;  %v2454_v48 = vpack.c.bf16 %v3663_v12, %v3662_v1  ;;  %v3719_v12 = vld [vmem:[%s4825_s11 + $0x96] sm:$0xff] }
  0xb3   : > { %4572 = vmatprep.subr.msk.bf16.mxu1 %vm355_vm0, %v4798_v0  ;;  %v3387_v0 = vld [vmem:[%s4825_s11 + $0x62] sm:$0xff]  ;;  %v5268_v30 = vpack.c.bf16 %v3408_v44, %v3407_v39  ;;  %v2782_v44 = vpack.c.bf16 %v3718_v62, %v3717_v37  ;;  %v3465_v1 = vld [vmem:[%s4825_s11 + $0x12a] sm:$0xff] }
  0xb4   : > { %v5176_v53 = vpack.c.bf16 %v3388_v49, %v3387_v0  ;;  %v3409_v0 = vld [vmem:[%s4825_s11 + $0x112] sm:$0xff]  ;;  %v3410_v49 = vld [vmem:[%s4825_s11 + $0x11a] sm:$0xff] }
  0xb8   : > { %4018 = vmatmul.mubr.msk.bf16.gmra.mrb[4].mxu1 %vm300_vm1, %v5158_v47  ;;  %4186 = vmatmul.mubr.msk.bf16.gmra.mrb[20].mxu0 %vm300_vm1, %v5027_v32  ;;  %v3389_v32 = vld [vmem:[%s4825_s11 + $0x72] sm:$0xff] }
  0xb9   : > { %4021 = vmatprep.mubr.msk.bf16.mxu1 %vm300_vm1, %v5160_v14  ;;  %4189 = vmatprep.mubr.msk.bf16.mxu0 %vm300_vm1, %v5043_v43  ;;  %v3390_v43 = vld [vmem:[%s4825_s11 + $0x7a] sm:$0xff] }
  0xba   : > { %v5190_v56 = vpack.c.bf16 %v3390_v43, %v3389_v32  ;;  %v3664_v32 = vld [vmem:[%s4825_s11 + $0x95] sm:$0xff]  ;;  %v3665_v43 = vld [vmem:[%s4825_s11 + $0x9d] sm:$0xff] }
  0xc0   : > { %4022 = vmatmul.mubr.msk.bf16.gmra.mrb[8].mxu1 %vm300_vm1, %v5174_v51  ;;  %4190 = vmatmul.mubr.msk.bf16.gmra.mrb[24].mxu0 %vm300_vm1, %v5045_v45  ;;  %v3393_v45 = vld [vmem:[%s4825_s11 + $0x92] sm:$0xff] }
  0xc1   : > { %4025 = vmatprep.mubr.msk.bf16.mxu1 %vm300_vm1, %v5176_v53  ;;  %4193 = vmatprep.mubr.msk.bf16.mxu0 %vm300_vm1, %v5061_v57  ;;  %v3629_v57 = vld [vmem:[%s4825_s11 + $0x134] sm:$0xff]  ;;  %v5210_v5 = vpack.c.bf16 %v3394_v60, %v3393_v45  ;;  %v5282_v45 = vpack.c.bf16 %v3410_v49, %v3409_v0  ;;  %v2455_v60 = vpack.c.bf16 %v3665_v43, %v3664_v32 }
  0xc2   : > { %v2137_v6 = vpack.c.bf16 %v3630_v61, %v3629_v57  ;;  %v2456_v57 = vpack.c.bf16 %v3667_v55, %v3666_v54  ;;  %v3668_v61 = vld [vmem:[%s4825_s11 + $0xb5] sm:$0xff]  ;;  %v3507_v55 = vld [vmem:[%s4825_s11 + $0xc3] sm:$0xff] }
  0xc3   : > { %v3722_v0 = vld [vmem:[%s4825_s11 + $0xae] sm:$0xff] }
  0xc8   : > { %4026 = vmatmul.mubr.msk.bf16.gmra.mrb[12].mxu1 %vm300_vm1, %v5190_v56  ;;  %4194 = vmatmul.mubr.msk.bf16.gmra.mrb[28].mxu0 %vm300_vm1, %v5063_v59  ;;  %v3651_v59 = vld [vmem:[%s4825_s11 + $0x2d] sm:$0xff] }
  0xc9   : > { %4029 = vmatprep.mubr.msk.bf16.mxu1 %vm300_vm1, %v5192_v58  ;;  %4197 = vmatprep.mubr.msk.bf16.mxu0 %vm300_vm1, %v5077_v7  ;;  %v2448_v9 = vpack.c.bf16 %v3651_v59, %v3650_v4  ;;  %v3397_v7 = vld [vmem:[%s4825_s11 + $0xb2] sm:$0xff]  ;;  %v2457_v59 = vpack.c.bf16 %v3669_v63, %v3668_v61  ;;  %v3510_v63 = vld [vmem:[%s4825_s11 + $0xdb] sm:$0xff] }
  0xca   : > { %v5228_v27 = vpack.c.bf16 %v3398_v10, %v3397_v7  ;;  %v3671_v4 = vld [vmem:[%s4825_s11 + $0xcd] sm:$0xff]  ;;  %v3674_v7 = vld [vmem:[%s4825_s11 + $0xe5] sm:$0xff] }
  0xcb   : > { %v3675_v10 = vld [vmem:[%s4825_s11 + $0xed] sm:$0xff] }
  0xcc   : > { %v2460_v13 = vpack.c.bf16 %v3675_v10, %v3674_v7  ;;  %v3509_v61 = vld [vmem:[%s4825_s11 + $0xd3] sm:$0xff]  ;;  %v3511_v7 = vld [vmem:[%s4825_s11 + $0xe3] sm:$0xff]  ;;  %v3512_v10 = vld [vmem:[%s4825_s11 + $0xeb] sm:$0xff] }
  0xd0   : > { %4030 = vmatmul.mubr.msk.bf16.gmra.mrb[16].mxu1 %vm300_vm1, %v5210_v5  ;;  %4198 = vmatmul.mubr.msk.bf16.gmra.mrb[32].mxu0 %vm300_vm1, %v2137_v6  ;;  %v2458_v6 = vpack.c.bf16 %v3671_v4, %v3670_v3  ;;  %v3725_v3 = vld [vmem:[%s4825_s11 + $0xc6] sm:$0xff]  ;;  %v3726_v4 = vld [vmem:[%s4825_s11 + $0xce] sm:$0xff] }
  0xd1   : > { %4033 = vmatprep.mubr.msk.bf16.mxu1 %vm300_vm1, %v5212_v8  ;;  %4203 = vmatprep.mubr.msk.bf16.mxu0 %vm300_vm1, %v2448_v9  ;;  %v3673_v9 = vld [vmem:[%s4825_s11 + $0xdd] sm:$0xff] }
  0xd8   : > { %4034 = vmatmul.mubr.msk.bf16.gmra.mrb[20].mxu1 %vm300_vm1, %v5228_v27  ;;  %4204 = vmatmul.mubr.msk.bf16.vlgmr.msra.gmra.mrb[0].mxu0 %vm300_vm1, %v2449_v29  ;;  %v3683_v29 = vld [vmem:[%s4825_s11 + $0x12d] sm:$0xff] }
  0xd9   : > { %4037 = vmatprep.mubr.msk.bf16.mxu1 %vm300_vm1, %v5230_v20  ;;  %4240 = vmatpush3.bf16.msra.mxu0 %v2851_v22  ;;  %v2464_v22 = vpack.c.bf16 %v3683_v29, %v3682_v23  ;;  %v3515_v23 = vld [vmem:[%s4825_s11 + $0x103] sm:$0xff]  ;;  %v3516_v29 = vld [vmem:[%s4825_s11 + $0x10b] sm:$0xff] }
  0xda   : > { %4207 = vmatprep.mubr.msk.bf16.mxu0 %vm300_vm1, %v2450_v21 }
  0xe0   : > { %4038 = vmatmul.mubr.msk.bf16.gmra.mrb[24].mxu1 %vm300_vm1, %v5248_v33  ;;  %4208 = vmatmul.mubr.msk.bf16.gmra.mrb[4].mxu0 %vm300_vm1, %v2451_v50  ;;  %v3713_v50 = vld [vmem:[%s4825_s11 + $0x66] sm:$0xff] }
  0xe1   : > { %4041 = vmatprep.mubr.msk.bf16.mxu1 %vm300_vm1, %v5250_v34  ;;  %4211 = vmatprep.mubr.msk.bf16.mxu0 %vm300_vm1, %v2452_v35  ;;  %v3714_v35 = vld [vmem:[%s4825_s11 + $0x6e] sm:$0xff] }
  0xe2   : > { %v2780_v52 = vpack.c.bf16 %v3714_v35, %v3713_v50  ;;  %v1481_v50 = vpack.c.bf16 %v3520_v31, %v3519_v19 }
  0xe8   : > { %4042 = vmatmul.mubr.msk.bf16.gmra.mrb[28].mxu1 %vm300_vm1, %v5266_v16  ;;  %4212 = vmatmul.mubr.msk.bf16.gmra.mrb[8].mxu0 %vm300_vm1, %v2453_v46  ;;  %v3505_v46 = vld [vmem:[%s4825_s11 + $0xb3] sm:$0xff] }
  0xe9   : > { %4045 = vmatprep.mubr.msk.bf16.mxu1 %vm300_vm1, %v5268_v30  ;;  %4215 = vmatprep.mubr.msk.bf16.mxu0 %vm300_vm1, %v2454_v48  ;;  %v3506_v48 = vld [vmem:[%s4825_s11 + $0xbb] sm:$0xff] }
  0xea   : > { %v1474_v43 = vpack.c.bf16 %v3506_v48, %v3505_v46 }
  0xf0   : > { %4046 = vmatmul.mubr.msk.bf16.gmra.mrb[32].mxu1 %vm300_vm1, %v5282_v45  ;;  %4216 = vmatmul.mubr.msk.bf16.gmra.mrb[12].mxu0 %vm300_vm1, %v2455_v60  ;;  %v3723_v60 = vld [vmem:[%s4825_s11 + $0xb6] sm:$0xff] }
  0xf1   : > { %4051 = vmatprep.mubr.msk.bf16.mxu1 %vm300_vm1, %v5138_v41  ;;  %4219 = vmatprep.mubr.msk.bf16.mxu0 %vm300_vm1, %v2456_v57  ;;  %v3672_v41 = vld [vmem:[%s4825_s11 + $0xd5] sm:$0xff]  ;;  %v3724_v57 = vld [vmem:[%s4825_s11 + $0xbe] sm:$0xff] }
  0xf2   : > { %v2459_v11 = vpack.c.bf16 %v3673_v9, %v3672_v41  ;;  %v1476_v41 = vpack.c.bf16 %v3510_v63, %v3509_v61  ;;  %v2786_v9 = vpack.c.bf16 %v3726_v4, %v3725_v3  ;;  %v5453_v63 = vld [vmem:[%s5596_s2] ss:$0 sm:$0xff] }
  0xf8   : > { %4052 = vmatmul.mubr.msk.bf16.vlgmr.msra.gmra.mrb[0].mxu1 %vm300_vm1, %v5140_v42  ;;  %4220 = vmatmul.mubr.msk.bf16.gmra.mrb[16].mxu0 %vm300_vm1, %v2457_v59  ;;  %v3677_v42 = vld [vmem:[%s4825_s11 + $0xfd] sm:$0xff] }
  0xf9   : > { %4055 = vmatprep.mubr.msk.bf16.mxu1 %vm300_vm1, %v5158_v47  ;;  %4223 = vmatprep.mubr.msk.bf16.mxu0 %vm300_vm1, %v2458_v6  ;;  %v3678_v47 = vld [vmem:[%s4825_s11 + $0x105] sm:$0xff]  ;;  %v2785_v6 = vpack.c.bf16 %v3724_v57, %v3723_v60 }
  0xfa   : > { %4278 = vmatpush3.bf16.msra.mxu1 %v4809_v2  ;;  %v3676_v2 = vld [vmem:[%s4825_s11 + $0xf5] sm:$0xff]  ;;  %v2462_v18 = vpack.c.bf16 %v3679_v15, %v3678_v47  ;;  %v3729_v47 = vld [vmem:[%s4825_s11 + $0xe6] sm:$0xff] }
  0xfb   : > { %v2461_v17 = vpack.c.bf16 %v3677_v42, %v3676_v2  ;;  %v3513_v2 = vld [vmem:[%s4825_s11 + $0xf3] sm:$0xff]  ;;  %v3514_v42 = vld [vmem:[%s4825_s11 + $0xfb] sm:$0xff] }
  0xfc   : > { %v3730_v15 = vld [vmem:[%s4825_s11 + $0xee] sm:$0xff] }
 0x100   : > { %4056 = vmatmul.mubr.msk.bf16.gmra.mrb[4].mxu1 %vm300_vm1, %v5160_v14  ;;  %4224 = vmatmul.mubr.msk.bf16.gmra.mrb[20].mxu0 %vm300_vm1, %v2459_v11  ;;  %v3680_v14 = vld [vmem:[%s4825_s11 + $0x115] sm:$0xff] }
 0x101   : > { %4059 = vmatprep.mubr.msk.bf16.mxu1 %vm300_vm1, %v5174_v51  ;;  %4227 = vmatprep.mubr.msk.bf16.mxu0 %vm300_vm1, %v2460_v13  ;;  %v3681_v51 = vld [vmem:[%s4825_s11 + $0x11d] sm:$0xff] }
 0x102   : > { %v2463_v21 = vpack.c.bf16 %v3681_v51, %v3680_v14  ;;  %v3727_v11 = vld [vmem:[%s4825_s11 + $0xd6] sm:$0xff]  ;;  %v3728_v13 = vld [vmem:[%s4825_s11 + $0xde] sm:$0xff]  ;;  %v1478_v14 = vpack.c.bf16 %v3514_v42, %v3513_v2  ;;  %v2788_v51 = vpack.c.bf16 %v3730_v15, %v3729_v47 }
 0x108   : > { %4060 = vmatmul.mubr.msk.bf16.gmra.mrb[8].mxu1 %vm300_vm1, %v5176_v53  ;;  %4228 = vmatmul.mubr.msk.bf16.gmra.mrb[24].mxu0 %vm300_vm1, %v2461_v17  ;;  %v3684_v53 = vld [vmem:[%s4825_s11 + $0x135] sm:$0xff]  ;;  %v1477_v17 = vpack.c.bf16 %v3512_v10, %v3511_v7 }
 0x109   : > { %4063 = vmatprep.mubr.msk.bf16.mxu1 %vm300_vm1, %v5190_v56  ;;  %4231 = vmatprep.mubr.msk.bf16.mxu0 %vm300_vm1, %v2462_v18  ;;  %v3685_v56 = vld [vmem:[%s4825_s11 + $0x13d] sm:$0xff]  ;;  %v2787_v18 = vpack.c.bf16 %v3728_v13, %v3727_v11 }
 0x10a   : > { %v2465_v24 = vpack.c.bf16 %v3685_v56, %v3684_v53  ;;  %v3517_v53 = vld [vmem:[%s4825_s11 + $0x113] sm:$0xff]  ;;  %v3518_v56 = vld [vmem:[%s4825_s11 + $0x11b] sm:$0xff] }
 0x110   : > { %4064 = vmatmul.mubr.msk.bf16.gmra.mrb[12].mxu1 %vm300_vm1, %v5192_v58  ;;  %4232 = vmatmul.mubr.msk.bf16.gmra.mrb[28].mxu0 %vm300_vm1, %v2463_v21  ;;  %v3707_v58 = vld [vmem:[%s4825_s11 + $0x36] sm:$0xff] }
 0x111   : > { %4067 = vmatprep.mubr.msk.bf16.mxu1 %vm300_vm1, %v5210_v5  ;;  %4235 = vmatprep.mubr.msk.bf16.mxu0 %vm300_vm1, %v2464_v22  ;;  %v3708_v5 = vld [vmem:[%s4825_s11 + $0x3e] sm:$0xff]  ;;  %v3731_v21 = vld [vmem:[%s4825_s11 + $0xf6] sm:$0xff] }
 0x112   : > { %v2777_v26 = vpack.c.bf16 %v3708_v5, %v3707_v58  ;;  %v3732_v22 = vld [vmem:[%s4825_s11 + $0xfe] sm:$0xff]  ;;  %v1480_v58 = vpack.c.bf16 %v3518_v56, %v3517_v53  ;;  %v2790_v5 = vpack.c.bf16 %v3734_v38, %v3733_v25 }
 0x118   : > { %4068 = vmatmul.mubr.msk.bf16.gmra.mrb[16].mxu1 %vm300_vm1, %v5212_v8  ;;  %4236 = vmatmul.mubr.msk.bf16.gmra.mrb[32].mxu0 %vm300_vm1, %v2465_v24  ;;  %v3711_v8 = vld [vmem:[%s4825_s11 + $0x56] sm:$0xff]  ;;  %v1479_v24 = vpack.c.bf16 %v3516_v29, %v3515_v23 }
 0x119   : > { %4071 = vmatprep.mubr.msk.bf16.mxu1 %vm300_vm1, %v5228_v27  ;;  %4241 = vmatprep.mubr.msk.bf16.mxu0 %vm300_vm1, %v2776_v28  ;;  %v3712_v27 = vld [vmem:[%s4825_s11 + $0x5e] sm:$0xff]  ;;  %v2789_v28 = vpack.c.bf16 %v3732_v22, %v3731_v21 }
 0x11a   : > { %v2779_v36 = vpack.c.bf16 %v3712_v27, %v3711_v8  ;;  %v3737_v8 = vld [vmem:[%s4825_s11 + $0x126] sm:$0xff]  ;;  %v3738_v27 = vld [vmem:[%s4825_s11 + $0x12e] sm:$0xff] }
 0x120   : > { %4072 = vmatmul.mubr.msk.bf16.gmra.mrb[20].mxu1 %vm300_vm1, %v5230_v20  ;;  %4242 = vmatmul.mubr.msk.bf16.vlgmr.msra.gmra.mrb[0].mxu0 %vm300_vm1, %v2777_v26  ;;  %v3715_v20 = vld [vmem:[%s4825_s11 + $0x76] sm:$0xff] }
 0x121   : > { %4075 = vmatprep.mubr.msk.bf16.mxu1 %vm300_vm1, %v5248_v33  ;;  %4245 = vmatprep.mubr.msk.bf16.mxu0 %vm300_vm1, %v2778_v40  ;;  %v3716_v33 = vld [vmem:[%s4825_s11 + $0x7e] sm:$0xff]  ;;  %v3735_v26 = vld [vmem:[%s4825_s11 + $0x116] sm:$0xff] }
 0x122   : > { %v2781_v39 = vpack.c.bf16 %v3716_v33, %v3715_v20  ;;  %v3736_v40 = vld [vmem:[%s4825_s11 + $0x11e] sm:$0xff] }
 0x123   : > { %v2791_v35 = vpack.c.bf16 %v3736_v40, %v3735_v26  ;;  %v3740_v20 = vld [vmem:[%s4825_s11 + $0x13e] sm:$0xff] }
 0x128   : > { %4076 = vmatmul.mubr.msk.bf16.gmra.mrb[24].mxu1 %vm300_vm1, %v5250_v34  ;;  %4246 = vmatmul.mubr.msk.bf16.gmra.mrb[4].mxu0 %vm300_vm1, %v2779_v36  ;;  %v3464_v34 = vld [vmem:[%s4825_s11 + $0x122] sm:$0xff]  ;;  %v2792_v36 = vpack.c.bf16 %v3738_v27, %v3737_v8 }
 0x129   : > { %4079 = vmatprep.mubr.msk.bf16.mxu1 %vm300_vm1, %v5266_v16  ;;  %4249 = vmatprep.mubr.msk.bf16.mxu0 %vm300_vm1, %v2780_v52  ;;  %v3720_v16 = vld [vmem:[%s4825_s11 + $0x9e] sm:$0xff]  ;;  %v1153_v49 = vpack.c.bf16 %v3465_v1, %v3464_v34  ;;  %v3739_v52 = vld [vmem:[%s4825_s11 + $0x136] sm:$0xff] }
 0x12a   : > { %v2783_v32 = vpack.c.bf16 %v3720_v16, %v3719_v12  ;;  %v2793_v33 = vpack.c.bf16 %v3740_v20, %v3739_v52 }
 0x130   : > { %4080 = vmatmul.mubr.msk.bf16.gmra.mrb[28].mxu1 %vm300_vm1, %v5268_v30  ;;  %4250 = vmatmul.mubr.msk.bf16.gmra.mrb[8].mxu0 %vm300_vm1, %v2781_v39  ;;  %v3721_v30 = vld [vmem:[%s4825_s11 + $0xa6] sm:$0xff] }
 0x131   : > { %4083 = vmatprep.mubr.msk.bf16.mxu1 %vm300_vm1, %v5282_v45  ;;  %4253 = vmatprep.mubr.msk.bf16.mxu0 %vm300_vm1, %v2782_v44  ;;  %v2784_v54 = vpack.c.bf16 %v3722_v0, %v3721_v30  ;;  %v3508_v45 = vld [vmem:[%s4825_s11 + $0xcb] sm:$0xff]  ;;  %s3197_s11 = sshll.u32 %s5459_s9, 4  ;;  %s5541_s11 = int_to_ptr.vmem [resolvable:$true] %s3197_s11 }
 0x132   : > { %v1475_v59 = vpack.c.bf16 %v3508_v45, %v3507_v55  ;;  %s4637_s23 = scalar_lea.vmem %s5541_s11, 4608  ;;  %p4644_p1 = scmp.lt.s32.totalorder %s5541_s11, %s4642_s27 }
 0x133   : > { %p4638_p12 = scmp.ne.s32.totalorder %s5541_s11, %s4637_s23  ;;  %p4645_p2 = scmp.lt.s32.totalorder %s4643_s28, %s4637_s23 }
 0x135   : > { %p4639_p13 = pnand %p4638_p12, %p4780_p4  ;;  %p4646_p3 = por %p4645_p2, %p4644_p1 }
 0x137   : > { %p4640_p0 = pneg %p4639_p13 }
 0x138   : > { %4084 = vmatmul.mubr.msk.bf16.gmra.mrb[32].mxu1 %vm300_vm1, %v1153_v49  ;;  %4254 = vmatmul.mubr.msk.bf16.gmra.mrb[12].mxu0 %vm300_vm1, %v2783_v32 }
 0x139   : > { %4109 = vmatprep.mubr.msk.bf16.mxu1 %vm300_vm1, %v1474_v43  ;;  %4257 = vmatprep.mubr.msk.bf16.mxu0 %vm300_vm1, %v2784_v54  ;;  %p4647_p5 = pnand %p4646_p3, %p4640_p0 }
 0x140   : > { %4110 = vmatmul.mubr.msk.bf16.vlgmr.msra.gmra.mrb[20].mxu1 %vm300_vm1, %v1475_v59  ;;  %4258 = vmatmul.mubr.msk.bf16.gmra.mrb[16].mxu0 %vm300_vm1, %v2785_v6 }
 0x141   : > { %4113 = vmatprep.mubr.msk.bf16.mxu1 %vm300_vm1, %v1476_v41  ;;  %4261 = vmatprep.mubr.msk.bf16.mxu0 %vm300_vm1, %v2786_v9 }
 0x148   : > { %4114 = vmatmul.mubr.msk.bf16.gmra.mrb[24].mxu1 %vm300_vm1, %v1477_v17  ;;  %4262 = vmatmul.mubr.msk.bf16.gmra.mrb[20].mxu0 %vm300_vm1, %v2787_v18 }
 0x149   : > { %4117 = vmatprep.mubr.msk.bf16.mxu1 %vm300_vm1, %v1478_v14  ;;  %4265 = vmatprep.mubr.msk.bf16.mxu0 %vm300_vm1, %v2788_v51 }
 0x150   : > { %4118 = vmatmul.mubr.msk.bf16.gmra.mrb[28].mxu1 %vm300_vm1, %v1479_v24  ;;  %4266 = vmatmul.mubr.msk.bf16.gmra.mrb[24].mxu0 %vm300_vm1, %v2789_v28 }
 0x151   : > { %4121 = vmatprep.mubr.msk.bf16.mxu1 %vm300_vm1, %v1480_v58  ;;  %4269 = vmatprep.mubr.msk.bf16.mxu0 %vm300_vm1, %v2790_v5 }
 0x158   : > { %4122 = vmatmul.mubr.msk.bf16.gmra.mrb[32].mxu1 %vm300_vm1, %v1481_v50  ;;  %4270 = vmatmul.mubr.msk.bf16.gmra.mrb[28].mxu0 %vm300_vm1, %v2791_v35 }
 0x159   : > { %4273 = vmatprep.mubr.msk.bf16.mxu0 %vm300_vm1, %v2792_v36 }
 0x160   : > { %4274 = vmatmul.mubr.msk.bf16.gmra.mrb[32].mxu0 %vm300_vm1, %v2793_v33 }
 0x1cb   : > { %v4053_v37 = vpop.f32.mrb[0].mxu1 }
 0x1cc   : > { %v1247_v62 = vpop.f32.mrb[1].mxu1 }
 0x1cd   : > { %v4054_v39 = vpop.f32.mrb[2].mxu1 }
 0x1ce   : > { %v1250_v44 = vpop.f32.mrb[3].mxu1 }
 0x1d3   : > { %v4057_v34 = vpop.f32.mrb[4].mxu1 }
 0x1d4   : > { %v1263_v1 = vpop.f32.mrb[5].mxu1 }
 0x1d5   : > { %v4058_v12 = vpop.f32.mrb[6].mxu1 }
 0x1d6   : > { %v1266_v16 = vpop.f32.mrb[7].mxu1 }
 0x1db   : > { %v4061_v46 = vpop.f32.mrb[8].mxu1 }
 0x1dc   : > { %v1279_v48 = vpop.f32.mrb[9].mxu1 }
 0x1dd   : > { %v4062_v30 = vpop.f32.mrb[10].mxu1 }
 0x1de   : > { %v1282_v0 = vpop.f32.mrb[11].mxu1 }
 0x1e3   : > { %v5431_v49 = vpop.f32.mrb[12].mxu1 }
 0x1e4   : > { %v5433_v32 = vpop.f32.mrb[13].mxu1 }
 0x1e5   : > { %v5435_v43 = vpop.f32.mrb[14].mxu1 }
 0x1e6   : > { %v5437_v54 = vpop.f32.mrb[15].mxu1 }
 0x1eb   : > { %v5439_v55 = vpop.f32.mrb[16].mxu1 }
 0x1ec   : > { %v5441_v45 = vpop.f32.mrb[17].mxu1 }
 0x1ed   : > { %v5443_v60 = vpop.f32.mrb[18].mxu1 }
 0x1ee   : > { %v5445_v57 = vpop.f32.mrb[19].mxu1 }
 0x1f3   : > { %v4243_v61 = vpop.f32.mrb[0].mxu0 }
 0x1f4   : > { %v4279_v3 = vadd.f32 %v4243_v61, %v4053_v37  ;;  %v2887_v4 = vpop.f32.mrb[1].mxu0 }
 0x1f5   : > { %v4280_v59 = vadd.f32 %v2887_v4, %v1247_v62  ;;  %v4244_v6 = vpop.f32.mrb[2].mxu0 }
 0x1f6   : > { %v3075_v41 = vadd.f32 %v4279_v3, %v5453_v63  ;;  %v4281_v9 = vadd.f32 %v4244_v6, %v4054_v39  ;;  %v2890_v7 = vpop.f32.mrb[3].mxu0 }
 0x1f7   : > { %v3073_v10 = vadd.f32 %v4280_v59, %v5453_v63  ;;  %v4282_v11 = vadd.f32 %v2890_v7, %v1250_v44 }
 0x1f8   : > { %v3111_v13 = vmax.f32 %v3075_v41, 0.0  ;;  %v3076_v2 = vadd.f32 %v4281_v9, %v5453_v63 }
 0x1f9   : > { %v3109_v42 = vmax.f32 %v3073_v10, 0.0  ;;  %v3074_v47 = vadd.f32 %v4282_v11, %v5453_v63 }
 0x1fa   : > { %3147 = vst [vmem:[%s5459_s9 + $0x10] sm:$0xff] %v3111_v13  ;;  %v3112_v15 = vmax.f32 %v3076_v2, 0.0 }
 0x1fb   : > { %3145 = vst [vmem:[%s5459_s9] sm:$0xff] %v3109_v42  ;;  %v3110_v17 = vmax.f32 %v3074_v47, 0.0  ;;  %v4247_v18 = vpop.f32.mrb[4].mxu0 }
 0x1fc   : > { %3148 = vst [vmem:[%s5459_s9 + $0x18] sm:$0xff] %v3112_v15  ;;  %v4283_v14 = vadd.f32 %v4247_v18, %v4057_v34  ;;  %v2903_v51 = vpop.f32.mrb[5].mxu0 }
 0x1fd   : > { %3146 = vst [vmem:[%s5459_s9 + $0x8] sm:$0xff] %v3110_v17  ;;  %v4284_v23 = vadd.f32 %v2903_v51, %v1263_v1  ;;  %v4248_v29 = vpop.f32.mrb[6].mxu0 }
 0x1fe   : > { %v3079_v21 = vadd.f32 %v4283_v14, %v5453_v63  ;;  %v4285_v22 = vadd.f32 %v4248_v29, %v4058_v12  ;;  %v2906_v53 = vpop.f32.mrb[7].mxu0 }
 0x1ff   : > { %v3077_v56 = vadd.f32 %v4284_v23, %v5453_v63  ;;  %v4286_v25 = vadd.f32 %v2906_v53, %v1266_v16 }
 0x200   : > { %v3115_v38 = vmax.f32 %v3079_v21, 0.0  ;;  %v3080_v24 = vadd.f32 %v4285_v22, %v5453_v63 }
 0x201   : > { %v3113_v28 = vmax.f32 %v3077_v56, 0.0  ;;  %v3078_v58 = vadd.f32 %v4286_v25, %v5453_v63 }
 0x202   : > { %3151 = vst [vmem:[%s5459_s9 + $0x30] sm:$0xff] %v3115_v38  ;;  %v3116_v5 = vmax.f32 %v3080_v24, 0.0 }
 0x203   : > { %3149 = vst [vmem:[%s5459_s9 + $0x20] sm:$0xff] %v3113_v28  ;;  %v3114_v19 = vmax.f32 %v3078_v58, 0.0  ;;  %v4251_v31 = vpop.f32.mrb[8].mxu0 }
 0x204   : > { %3152 = vst [vmem:[%s5459_s9 + $0x38] sm:$0xff] %v3116_v5  ;;  %v4287_v26 = vadd.f32 %v4251_v31, %v4061_v46  ;;  %v2919_v40 = vpop.f32.mrb[9].mxu0 }
 0x205   : > { %3150 = vst [vmem:[%s5459_s9 + $0x28] sm:$0xff] %v3114_v19  ;;  %v4288_v8 = vadd.f32 %v2919_v40, %v1279_v48  ;;  %v4252_v27 = vpop.f32.mrb[10].mxu0 }
 0x206   : > { %v3083_v50 = vadd.f32 %v4287_v26, %v5453_v63  ;;  %v4289_v35 = vadd.f32 %v4252_v27, %v4062_v30  ;;  %v2922_v36 = vpop.f32.mrb[11].mxu0 }
 0x207   : > { %v3081_v52 = vadd.f32 %v4288_v8, %v5453_v63  ;;  %v4290_v20 = vadd.f32 %v2922_v36, %v1282_v0 }
 0x208   : > { %v3119_v33 = vmax.f32 %v3083_v50, 0.0  ;;  %v3084_v37 = vadd.f32 %v4289_v35, %v5453_v63 }
 0x209   : > { %v3117_v62 = vmax.f32 %v3081_v52, 0.0  ;;  %v3082_v39 = vadd.f32 %v4290_v20, %v5453_v63 }
 0x20a   : > { %3155 = vst [vmem:[%s5459_s9 + $0x50] sm:$0xff] %v3119_v33  ;;  %v3120_v44 = vmax.f32 %v3084_v37, 0.0 }
 0x20b   : > { %3153 = vst [vmem:[%s5459_s9 + $0x40] sm:$0xff] %v3117_v62  ;;  %v3118_v34 = vmax.f32 %v3082_v39, 0.0  ;;  %v4255_v1 = vpop.f32.mrb[12].mxu0 }
 0x20c   : > { %3156 = vst [vmem:[%s5459_s9 + $0x58] sm:$0xff] %v3120_v44  ;;  %v4291_v12 = vadd.f32 %v4255_v1, %v5431_v49  ;;  %v2935_v16 = vpop.f32.mrb[13].mxu0 }
 0x20d   : > { %3154 = vst [vmem:[%s5459_s9 + $0x48] sm:$0xff] %v3118_v34  ;;  %v4292_v46 = vadd.f32 %v2935_v16, %v5433_v32  ;;  %v4256_v48 = vpop.f32.mrb[14].mxu0 }
 0x20e   : > { %v3087_v30 = vadd.f32 %v4291_v12, %v5453_v63  ;;  %v4293_v0 = vadd.f32 %v4256_v48, %v5435_v43  ;;  %v2938_v61 = vpop.f32.mrb[15].mxu0 }
 0x20f   : > { %v3085_v3 = vadd.f32 %v4292_v46, %v5453_v63  ;;  %v4294_v4 = vadd.f32 %v2938_v61, %v5437_v54 }
 0x210   : > { %v3123_v59 = vmax.f32 %v3087_v30, 0.0  ;;  %v3088_v49 = vadd.f32 %v4293_v0, %v5453_v63 }
 0x211   : > { %v3121_v6 = vmax.f32 %v3085_v3, 0.0  ;;  %v3086_v41 = vadd.f32 %v4294_v4, %v5453_v63 }
 0x212   : > { %3159 = vst [vmem:[%s5459_s9 + $0x70] sm:$0xff] %v3123_v59  ;;  %v3124_v32 = vmax.f32 %v3088_v49, 0.0 }
 0x213   : > { %v4111_v9 = vpop.f32.mrb[20].mxu1  ;;  %3157 = vst [vmem:[%s5459_s9 + $0x60] sm:$0xff] %v3121_v6  ;;  %v3122_v7 = vmax.f32 %v3086_v41, 0.0  ;;  %v4259_v10 = vpop.f32.mrb[16].mxu0 }
 0x214   : > { %v1655_v11 = vpop.f32.mrb[21].mxu1  ;;  %3160 = vst [vmem:[%s5459_s9 + $0x78] sm:$0xff] %v3124_v32  ;;  %v4295_v43 = vadd.f32 %v4259_v10, %v5439_v55  ;;  %v2951_v13 = vpop.f32.mrb[17].mxu0 }
 0x215   : > { %v4112_v54 = vpop.f32.mrb[22].mxu1  ;;  %3158 = vst [vmem:[%s5459_s9 + $0x68] sm:$0xff] %v3122_v7  ;;  %v4296_v2 = vadd.f32 %v2951_v13, %v5441_v45  ;;  %v4260_v42 = vpop.f32.mrb[18].mxu0 }
 0x216   : > { %v1658_v47 = vpop.f32.mrb[23].mxu1  ;;  %v3091_v15 = vadd.f32 %v4295_v43, %v5453_v63  ;;  %v4297_v17 = vadd.f32 %v4260_v42, %v5443_v60  ;;  %v2954_v18 = vpop.f32.mrb[19].mxu0 }
 0x217   : > { %v3089_v14 = vadd.f32 %v4296_v2, %v5453_v63  ;;  %v4298_v51 = vadd.f32 %v2954_v18, %v5445_v57 }
 0x218   : > { %v3127_v55 = vmax.f32 %v3091_v15, 0.0  ;;  %v3092_v23 = vadd.f32 %v4297_v17, %v5453_v63 }
 0x219   : > { %v3125_v29 = vmax.f32 %v3089_v14, 0.0  ;;  %v3090_v21 = vadd.f32 %v4298_v51, %v5453_v63 }
 0x21a   : > { %3163 = vst [vmem:[%s5459_s9 + $0x90] sm:$0xff] %v3127_v55  ;;  %v3128_v45 = vmax.f32 %v3092_v23, 0.0 }
 0x21b   : > { %v4115_v22 = vpop.f32.mrb[24].mxu1  ;;  %3161 = vst [vmem:[%s5459_s9 + $0x80] sm:$0xff] %v3125_v29  ;;  %v3126_v53 = vmax.f32 %v3090_v21, 0.0  ;;  %v4263_v56 = vpop.f32.mrb[20].mxu0 }
 0x21c   : > { %v1671_v25 = vpop.f32.mrb[25].mxu1  ;;  %3164 = vst [vmem:[%s5459_s9 + $0x98] sm:$0xff] %v3128_v45  ;;  %v4299_v60 = vadd.f32 %v4263_v56, %v4111_v9  ;;  %v2967_v38 = vpop.f32.mrb[21].mxu0 }
 0x21d   : > { %v4116_v24 = vpop.f32.mrb[26].mxu1  ;;  %3162 = vst [vmem:[%s5459_s9 + $0x88] sm:$0xff] %v3126_v53  ;;  %v4300_v57 = vadd.f32 %v2967_v38, %v1655_v11  ;;  %v4264_v28 = vpop.f32.mrb[22].mxu0 }
 0x21e   : > { %v1674_v58 = vpop.f32.mrb[27].mxu1  ;;  %v3095_v5 = vadd.f32 %v4299_v60, %v5453_v63  ;;  %v4301_v19 = vadd.f32 %v4264_v28, %v4112_v54  ;;  %v2970_v31 = vpop.f32.mrb[23].mxu0 }
 0x21f   : > { %v3093_v26 = vadd.f32 %v4300_v57, %v5453_v63  ;;  %v4302_v40 = vadd.f32 %v2970_v31, %v1658_v47 }
 0x220   : > { %v3131_v8 = vmax.f32 %v3095_v5, 0.0  ;;  %v3096_v27 = vadd.f32 %v4301_v19, %v5453_v63 }
 0x221   : > { %v3129_v50 = vmax.f32 %v3093_v26, 0.0  ;;  %v3094_v35 = vadd.f32 %v4302_v40, %v5453_v63 }
 0x222   : > { %3167 = vst [vmem:[%s5459_s9 + $0xb0] sm:$0xff] %v3131_v8  ;;  %v3132_v36 = vmax.f32 %v3096_v27, 0.0 }
 0x223   : > { %v4119_v52 = vpop.f32.mrb[28].mxu1  ;;  %3165 = vst [vmem:[%s5459_s9 + $0xa0] sm:$0xff] %v3129_v50  ;;  %v3130_v20 = vmax.f32 %v3094_v35, 0.0  ;;  %v4267_v33 = vpop.f32.mrb[24].mxu0 }
 0x224   : > { %v1687_v37 = vpop.f32.mrb[29].mxu1  ;;  %3168 = vst [vmem:[%s5459_s9 + $0xb8] sm:$0xff] %v3132_v36  ;;  %v4303_v62 = vadd.f32 %v4267_v33, %v4115_v22  ;;  %v2983_v39 = vpop.f32.mrb[25].mxu0 }
 0x225   : > { %v4120_v44 = vpop.f32.mrb[30].mxu1  ;;  %3166 = vst [vmem:[%s5459_s9 + $0xa8] sm:$0xff] %v3130_v20  ;;  %v4304_v34 = vadd.f32 %v2983_v39, %v1671_v25  ;;  %v4268_v1 = vpop.f32.mrb[26].mxu0 }
 0x226   : > { %v1690_v12 = vpop.f32.mrb[31].mxu1  ;;  %v3099_v16 = vadd.f32 %v4303_v62, %v5453_v63  ;;  %v4305_v46 = vadd.f32 %v4268_v1, %v4116_v24  ;;  %v2986_v48 = vpop.f32.mrb[27].mxu0 }
 0x227   : > { %v3097_v30 = vadd.f32 %v4304_v34, %v5453_v63  ;;  %v4306_v0 = vadd.f32 %v2986_v48, %v1674_v58 }
 0x228   : > { %v3135_v61 = vmax.f32 %v3099_v16, 0.0  ;;  %v3100_v3 = vadd.f32 %v4305_v46, %v5453_v63 }
 0x229   : > { %v3133_v4 = vmax.f32 %v3097_v30, 0.0  ;;  %v3098_v59 = vadd.f32 %v4306_v0, %v5453_v63 }
 0x22a   : > { %3171 = vst [vmem:[%s5459_s9 + $0xd0] sm:$0xff] %v3135_v61  ;;  %v3136_v49 = vmax.f32 %v3100_v3, 0.0 }
 0x22b   : > { %v4123_v6 = vpop.f32.mrb[32].mxu1  ;;  %3169 = vst [vmem:[%s5459_s9 + $0xc0] sm:$0xff] %v3133_v4  ;;  %v3134_v41 = vmax.f32 %v3098_v59, 0.0  ;;  %v4271_v32 = vpop.f32.mrb[28].mxu0 }
 0x22c   : > { %v1703_v9 = vpop.f32.mrb[33].mxu1  ;;  %3172 = vst [vmem:[%s5459_s9 + $0xd8] sm:$0xff] %v3136_v49  ;;  %v4307_v7 = vadd.f32 %v4271_v32, %v4119_v52  ;;  %v2999_v10 = vpop.f32.mrb[29].mxu0 }
 0x22d   : > { %v4124_v11 = vpop.f32.mrb[34].mxu1  ;;  %3170 = vst [vmem:[%s5459_s9 + $0xc8] sm:$0xff] %v3134_v41  ;;  %v4308_v43 = vadd.f32 %v2999_v10, %v1687_v37  ;;  %v4272_v13 = vpop.f32.mrb[30].mxu0 }
 0x22e   : > { %v1706_v54 = vpop.f32.mrb[35].mxu1  ;;  %v3103_v2 = vadd.f32 %v4307_v7, %v5453_v63  ;;  %v4309_v42 = vadd.f32 %v4272_v13, %v4120_v44  ;;  %v3002_v47 = vpop.f32.mrb[31].mxu0 }
 0x22f   : > { %v3101_v15 = vadd.f32 %v4308_v43, %v5453_v63  ;;  %v4310_v17 = vadd.f32 %v3002_v47, %v1690_v12 }
 0x230   : > { %v3139_v18 = vmax.f32 %v3103_v2, 0.0  ;;  %v3104_v14 = vadd.f32 %v4309_v42, %v5453_v63 }
 0x231   : > { %v3137_v51 = vmax.f32 %v3101_v15, 0.0  ;;  %v3102_v55 = vadd.f32 %v4310_v17, %v5453_v63 }
 0x232   : > { %3175 = vst [vmem:[%s5459_s9 + $0xf0] sm:$0xff] %v3139_v18  ;;  %v3140_v23 = vmax.f32 %v3104_v14, 0.0 }
 0x233   : > { %3173 = vst [vmem:[%s5459_s9 + $0xe0] sm:$0xff] %v3137_v51  ;;  %v3138_v29 = vmax.f32 %v3102_v55, 0.0  ;;  %v4275_v21 = vpop.f32.mrb[32].mxu0 }
 0x234   : > { %3176 = vst [vmem:[%s5459_s9 + $0xf8] sm:$0xff] %v3140_v23  ;;  %v4311_v45 = vadd.f32 %v4275_v21, %v4123_v6  ;;  %v3015_v22 = vpop.f32.mrb[33].mxu0 }
 0x235   : > { %3174 = vst [vmem:[%s5459_s9 + $0xe8] sm:$0xff] %v3138_v29  ;;  %v4312_v53 = vadd.f32 %v3015_v22, %v1703_v9  ;;  %v4276_v56 = vpop.f32.mrb[34].mxu0 }
 0x236   : > { %v3107_v25 = vadd.f32 %v4311_v45, %v5453_v63  ;;  %v4313_v60 = vadd.f32 %v4276_v56, %v4124_v11  ;;  %v3018_v38 = vpop.f32.mrb[35].mxu0 }
 0x237   : > { %v3105_v24 = vadd.f32 %v4312_v53, %v5453_v63  ;;  %v4314_v57 = vadd.f32 %v3018_v38, %v1706_v54 }
 0x238   : > { %v3143_v28 = vmax.f32 %v3107_v25, 0.0  ;;  %v3108_v58 = vadd.f32 %v4313_v60, %v5453_v63 }
 0x239   : > { %v3141_v5 = vmax.f32 %v3105_v24, 0.0  ;;  %v3106_v19 = vadd.f32 %v4314_v57, %v5453_v63 }
 0x23a   : > { %3179 = vst [vmem:[%s5459_s9 + $0x110] sm:$0xff] %v3143_v28  ;;  %v3144_v31 = vmax.f32 %v3108_v58, 0.0 }
 0x23b   : > { %3177 = vst [vmem:[%s5459_s9 + $0x100] sm:$0xff] %v3141_v5  ;;  %v3142_v26 = vmax.f32 %v3106_v19, 0.0 }
 0x23c   : > { %3180 = vst [vmem:[%s5459_s9 + $0x118] sm:$0xff] %v3144_v31 }
 0x23d   : > { %3178 = vst [vmem:[%s5459_s9 + $0x108] sm:$0xff] %v3142_v26 }
 0x23e   : > { %4650 = shalt.err (!%p4647_p5)
}
 0x23f   : > { %s4651_s29 = scalar_lea.hbm %s5539_s21, 4608  ;;  %s4655_s5 = scalar_lea.hbm %s5597_s3, 9216 }
 0x240   : > { %p4652_p6 = scmp.ne.s32.totalorder %s5539_s21, %s4651_s29  ;;  %p4656_p10 = scmp.lt.u32.totalorder %s5539_s21, %s5597_s3 }
 0x241   : > { %p4657_p11 = scmp.lt.u32.totalorder %s4655_s5, %s4651_s29  ;;  %p4659_p13 = scmp.lt.u32.totalorder %s4651_s29, %s5539_s21 }
 0x242   : > { %p4653_p7 = pnand %p4652_p6, %p4780_p4 }
 0x243   : > { %p4658_p12 = por %p4657_p11, %p4656_p10 }
 0x244   : > { %p4654_p9 = pneg %p4653_p7 }
 0x245   : > { %p4660_p0 = por %p4659_p13, %p4658_p12 }
 0x247   : > { %p4661_p1 = pnand %p4660_p0, %p4654_p9 }
 0x249   : > { %4664 = shalt.err (!%p4661_p1)
}
 0x24a   : > { %s4718_s8 = smov 128   ;;  %s4719_s9 = smov 8  }
 0x24b   : > { %4580 = dma.vmem_to_hbm [thread:$0]  (%p4780_p4), %s5541_s11, 4608, %s5539_s21, %s5548_s15, %s4718_s8, %s4718_s8, %s4719_s9  }
 0x24c PF: > { %p4586_p2 = scmp.ge.s32.totalorder %s4715_s17, 2  ;;  %s3212_s10 = sand.u32 1, %s4695_s12  }
 0x24d   : > { %s3213_s18 = scalar_lea.sflag [#allocation3], %s3212_s10 }
 0x24e   : > { %p4583_p3 = pnand %p4586_p2, %p4787_p8 }
 0x250   : > { %4690 = dma.done.wait (!%p4583_p3), %s3213_s18, 4608  }
 0x251   : > { %4692 = vsyncadd (!%p4583_p3), %s3213_s18, 4294962688  ;;  %s16_s17 = sadd.s32 1, %s4715_s17   ;;  %s5600_s12 = smov %s4699_s13 }
 0x252   : > { %p13_p5 = scmp.ge.s32.totalorder %s16_s17, 4   ;;  %s5601_s13 = smov %s4703_s14 }
 0x253   : > { %s5602_s14 = smov %s4793_s25  ;;  %s5603_s15 = smov %s4711_s16 }
 0x254   : > { %s5604_s16 = smov %s5606_s20  ;;  %15 = sbr.rel (!%p13_p5) target bundleno = 4 (0x4), region = 84 }
 0x25b   :  { %3218 = vsyncpa [#allocation3], 1 }
 0x25c   :  { %3220 = vsyncpa [#allocation3 + $0x1], 1 }

</bundles_post_ra>
